<compile_context>
chip_gen: v6e
topology: v6e:2x2x1
jax: 0.10.0
libtpu: 0.0.40
codegen_flags: <defaults>
</compile_context>

<pallas_src>
import math

import jax
import jax.numpy as jnp
import numpy as np
from jax.experimental import pallas as pl
from jax.experimental.pallas import tpu as pltpu

D_INPUT = 25
D_INPUT_PAD = 32          # zero-padded contraction dim for the input linear
D_MODEL = 32
N_HEAD = 4
HEAD_DIM = D_MODEL // N_HEAD
D_FF = 64
NUM_LAYERS = 2
EPS = 1e-5


def _layer_norm(x, w, b):
    mu = jnp.mean(x, axis=-1, keepdims=True)
    xc = x - mu
    var = jnp.mean(xc * xc, axis=-1, keepdims=True)
    return xc * jax.lax.rsqrt(var + EPS) * w + b


def _mini_transformer_kernel(
    x_ref,      # (BB, S, D_INPUT_PAD)
    peb_ref,    # (S, D)        positional encoding + input-linear bias (folded)
    wi_ref,     # (D_INPUT_PAD, D)
    wqkv_ref,   # (L, D, 3D)    fused QKV weight
    wo_ref,     # (L, D, D)     attention out-proj
    wf1_ref,    # (L, D, D_FF)
    wf2_ref,    # (L, D_FF, D)
    vec_ref,    # (L, 8, 3D)    packed biases + layernorm params
    lnf_ref,    # (2, D)        final layernorm weight / bias
    out_ref,    # (BB, 2D)
):
    BB, S, _ = x_ref.shape
    M = BB * S
    D = D_MODEL

    # ---- input linear (+ positional encoding, bias folded into peb) ----
    x = x_ref[...].reshape(M, D_INPUT_PAD)
    h = jnp.dot(x, wi_ref[...], preferred_element_type=jnp.float32)        # (M, D)
    h = (h.reshape(BB, S, D) + peb_ref[...][None]).reshape(M, D)

    scale = 1.0 / math.sqrt(HEAD_DIM)
    for l in range(NUM_LAYERS):                       # static unroll (NUM_LAYERS = 2)
        vec = vec_ref[l]                              # (8, 3D)
        b_qkv = vec[0:1, :]                           # (1, 3D)
        b_ff1 = vec[1:2, :D_FF]
        b_o = vec[2:3, :D]
        b_ff2 = vec[3:4, :D]
        n1w, n1b = vec[4:5, :D], vec[5:6, :D]
        n2w, n2b = vec[6:7, :D], vec[7:8, :D]

        # ---- multi-head self-attention: fused QKV, per-head softmax, fused out-proj ----
        qkv = jnp.dot(h, wqkv_ref[l], preferred_element_type=jnp.float32) + b_qkv
        qkv = qkv.reshape(BB, S, 3 * D)

        heads = []
        for hd in range(N_HEAD):                      # static unroll (N_HEAD = 4)
            lo = hd * HEAD_DIM
            qh = qkv[:, :, lo:lo + HEAD_DIM]                          # (BB, S, dh)
            kh = qkv[:, :, D + lo:D + lo + HEAD_DIM]
            vh = qkv[:, :, 2 * D + lo:2 * D + lo + HEAD_DIM]
            s = jax.lax.dot_general(                                  # (BB, S, S)
                qh * scale, kh, (((2,), (2,)), ((0,), (0,))),
                preferred_element_type=jnp.float32)
            s = s - jnp.max(s, axis=-1, keepdims=True)
            p = jnp.exp(s)
            p = p * pl.reciprocal(jnp.sum(p, axis=-1, keepdims=True), approx=True)
            heads.append(jax.lax.dot_general(                         # (BB, S, dh)
                p, vh, (((2,), (1,)), ((0,), (0,))),
                preferred_element_type=jnp.float32))

        attn = jnp.concatenate(heads, axis=-1).reshape(M, D)          # concat heads
        attn = jnp.dot(attn, wo_ref[l], preferred_element_type=jnp.float32) + b_o
        # TODO(synk): dropout(p=0.1) intentionally omitted (inference semantics)
        h = _layer_norm(h + attn, n1w, n1b)

        # ---- feed-forward ----
        ff = jnp.dot(h, wf1_ref[l], preferred_element_type=jnp.float32) + b_ff1
        ff = jnp.maximum(ff, 0.0)
        ff = jnp.dot(ff, wf2_ref[l], preferred_element_type=jnp.float32) + b_ff2
        h = _layer_norm(h + ff, n2w, n2b)

    lnf = lnf_ref[...]
    out = _layer_norm(h, lnf[0:1, :], lnf[1:2, :]).reshape(BB, S, D)
    # two stores instead of a lane concat
    out_ref[:, :D] = jnp.mean(out, axis=1)
    out_ref[:, D:] = jnp.max(out, axis=1)


def mini_transformer(x, packed, *, block_b=64):
    """x: (B, S, D_INPUT) float32 -> (B, 2*D_MODEL)."""
    B, S, d_in = x.shape
    assert d_in == D_INPUT

    # zero-pad the feature dim to an 8-aligned contraction (wi is padded the same way)
    x = jnp.pad(x, ((0, 0), (0, 0), (0, D_INPUT_PAD - d_in)))

    # Batch blocking: BLOCK_B examples per grid step. At realistic B the grid has
    # many "parallel" steps (keeps both v7x TensorCores busy); VMEM is never the
    # binding constraint at these shapes so no vmem_limit_bytes override is needed.
    block_b = max(1, min(block_b, B))
    n_blocks = pl.cdiv(B, block_b)
    b_pad = n_blocks * block_b
    if b_pad != B:
        x = jnp.pad(x, ((0, b_pad - B), (0, 0), (0, 0)))

    peb = packed[0]
    assert peb.shape[0] == S, "positional encoding must be built for this seq_len"

    def full_spec(a):
        return pl.BlockSpec(a.shape, lambda b, n=a.ndim: (0,) * n)

    out = pl.pallas_call(
        _mini_transformer_kernel,
        out_shape=jax.ShapeDtypeStruct((b_pad, 2 * D_MODEL), jnp.float32),
        grid=(n_blocks,),
        in_specs=[pl.BlockSpec((block_b, S, D_INPUT_PAD), lambda b: (b, 0, 0))]
        + [full_spec(a) for a in packed],
        out_specs=pl.BlockSpec((block_b, 2 * D_MODEL), lambda b: (b, 0)),
        compiler_params=pltpu.CompilerParams(dimension_semantics=("parallel",)),
    )(x, *packed)
    return out[:B]


def make_positional_encoding(seq_len, d_model):
    position = jnp.arange(seq_len, dtype=jnp.float32)[:, None]
    div_term = jnp.exp(jnp.arange(0, d_model, 2, dtype=jnp.float32)
                       * (-math.log(10000.0) / d_model))
    pe = jnp.zeros((seq_len, d_model), jnp.float32)
    pe = pe.at[:, 0::2].set(jnp.sin(position * div_term))
    pe = pe.at[:, 1::2].set(jnp.cos(position * div_term))
    return pe


def init_params(key):
    """Raw parameters in PyTorch layout (Linear weights are (out, in))."""
    keys = iter(jax.random.split(key, 64))

    def rnd(shape, scale=0.1):
        return jax.random.normal(next(keys), shape, jnp.float32) * scale

    raw = {
        "wi": rnd((D_MODEL, D_INPUT)),
        "bi": rnd((D_MODEL,)),
        "layers": [],
        "lnw": 1.0 + rnd((D_MODEL,), 0.05),
        "lnb": rnd((D_MODEL,), 0.05),
    }
    for _ in range(NUM_LAYERS):
        raw["layers"].append({
            "in_w": rnd((3 * D_MODEL, D_MODEL)),   # MultiheadAttention in_proj_weight
            "in_b": rnd((3 * D_MODEL,)),
            "out_w": rnd((D_MODEL, D_MODEL)),      # out_proj
            "out_b": rnd((D_MODEL,)),
            "l1_w": rnd((D_FF, D_MODEL)),
            "l1_b": rnd((D_FF,)),
            "l2_w": rnd((D_MODEL, D_FF)),
            "l2_b": rnd((D_MODEL,)),
            "n1w": 1.0 + rnd((D_MODEL,), 0.05),
            "n1b": rnd((D_MODEL,), 0.05),
            "n2w": 1.0 + rnd((D_MODEL,), 0.05),
            "n2b": rnd((D_MODEL,), 0.05),
        })
    return raw


def pack_params(raw, pe):
    """Consolidate raw params into a few stacked, pre-transposed tensors for the kernel."""
    D = D_MODEL
    peb = pe + raw["bi"][None, :]                     # fold input-linear bias into PE
    wi = jnp.zeros((D_INPUT_PAD, D), jnp.float32).at[:D_INPUT].set(raw["wi"].T)

    def pad_to(v, width):
        return jnp.pad(v, (0, width - v.shape[0]))

    wqkv, wo, wf1, wf2, vecs = [], [], [], [], []
    for L in raw["layers"]:
        wqkv.append(L["in_w"].T)                      # (D, 3D): [Q | K | V] columns
        wo.append(L["out_w"].T)                       # (D, D)
        wf1.append(L["l1_w"].T)                       # (D, D_FF)
        wf2.append(L["l2_w"].T)                       # (D_FF, D)
        vecs.append(jnp.stack([
            L["in_b"],                                # row 0: fused QKV bias (3D)
            pad_to(L["l1_b"], 3 * D),                 # row 1: linear1 bias
            pad_to(L["out_b"], 3 * D),                # row 2: out-proj bias
            pad_to(L["l2_b"], 3 * D),                 # row 3: linear2 bias
            pad_to(L["n1w"], 3 * D),                  # rows 4-7: layernorm 1/2 w & b
            pad_to(L["n1b"], 3 * D),
            pad_to(L["n2w"], 3 * D),
            pad_to(L["n2b"], 3 * D),
        ], axis=0))
    lnf = jnp.stack([raw["lnw"], raw["lnb"]], axis=0)  # (2, D)

    st = lambda xs: jnp.stack(xs, axis=0)
    return (peb, wi, st(wqkv), st(wo), st(wf1), st(wf2), st(vecs), lnf)


def reference(x, raw, pe):
    """Pure-JAX mirror of the PyTorch MiniTransformer forward (eval mode)."""
    hp = jax.lax.Precision.HIGHEST
    D = D_MODEL
    B, S, _ = x.shape

    h = jnp.einsum("bsi,oi->bso", x, raw["wi"], precision=hp) + raw["bi"]
    h = h + pe[None]
    scale = 1.0 / math.sqrt(HEAD_DIM)
    for L in raw["layers"]:
        q = jnp.einsum("bsd,od->bso", h, L["in_w"][:D], precision=hp) + L["in_b"][:D]
        k = jnp.einsum("bsd,od->bso", h, L["in_w"][D:2 * D], precision=hp) + L["in_b"][D:2 * D]
        v = jnp.einsum("bsd,od->bso", h, L["in_w"][2 * D:], precision=hp) + L["in_b"][2 * D:]
        qh = q.reshape(B, S, N_HEAD, HEAD_DIM)
        kh = k.reshape(B, S, N_HEAD, HEAD_DIM)
        vh = v.reshape(B, S, N_HEAD, HEAD_DIM)
        sc = jnp.einsum("bqhd,bkhd->bhqk", qh, kh, precision=hp) * scale
        p = jax.nn.softmax(sc, axis=-1)
        o = jnp.einsum("bhqk,bkhd->bqhd", p, vh, precision=hp).reshape(B, S, D)
        attn = jnp.einsum("bsd,od->bso", o, L["out_w"], precision=hp) + L["out_b"]
        h = _layer_norm(h + attn, L["n1w"], L["n1b"])
        ff = jnp.maximum(jnp.einsum("bsd,fd->bsf", h, L["l1_w"], precision=hp) + L["l1_b"], 0.0)
        ff = jnp.einsum("bsf,of->bso", ff, L["l2_w"], precision=hp) + L["l2_b"]
        h = _layer_norm(h + ff, L["n2w"], L["n2b"])
    out = _layer_norm(h, raw["lnw"], raw["lnb"])
    return jnp.concatenate([out.mean(axis=1), out.max(axis=1)], axis=-1)


if __name__ == "__main__":
    B, S = 2, 8
    key = jax.random.PRNGKey(0)
    kx, kp = jax.random.split(key)
    x = jax.random.normal(kx, (B, S, D_INPUT), jnp.float32)
    raw = init_params(kp)
    pe = make_positional_encoding(S, D_MODEL)
    packed = pack_params(raw, pe)

    out = jax.block_until_ready(mini_transformer(x, packed))
    ref = jax.block_until_ready(reference(x, raw, pe))

    assert out.shape == (B, 2 * D_MODEL), out.shape
    if not np.allclose(np.asarray(out), np.asarray(ref), atol=1e-3, rtol=1e-3):
        err = float(np.max(np.abs(np.asarray(out) - np.asarray(ref))))
        raise AssertionError(f"Pallas kernel does not match JAX reference (max abs err {err})")
    print("KERNEL_OK")
</pallas_src>

<mosaic_0001>
module attributes {stable_mosaic.version = 11 : i64} {
  func.func @_mini_transformer_kernel(%arg0: i32, %arg1: memref<2x8x32xf32, #tpu.memory_space<vmem>>, %arg2: memref<8x32xf32, #tpu.memory_space<vmem>>, %arg3: memref<32x32xf32, #tpu.memory_space<vmem>>, %arg4: memref<2x32x96xf32, #tpu.memory_space<vmem>>, %arg5: memref<2x32x32xf32, #tpu.memory_space<vmem>>, %arg6: memref<2x32x64xf32, #tpu.memory_space<vmem>>, %arg7: memref<2x64x32xf32, #tpu.memory_space<vmem>>, %arg8: memref<2x8x96xf32, #tpu.memory_space<vmem>>, %arg9: memref<2x32xf32, #tpu.memory_space<vmem>>, %arg10: memref<2x64xf32, #tpu.memory_space<vmem>>) attributes {dimension_semantics = [#tpu.dimension_semantics<parallel>], iteration_bounds = array<i64: 1>, scalar_prefetch = 0 : i64, scratch_operands = 0 : i64, tpu.core_type = #tpu.core_type<tc>, window_params = [{transform_indices = @transform_0, window_bounds = array<i64: 2, 8, 32>}, {pipeline_mode = #tpu.pipeline_mode<synchronous>, transform_indices = @transform_1, window_bounds = array<i64: 8, 32>}, {pipeline_mode = #tpu.pipeline_mode<synchronous>, transform_indices = @transform_2, window_bounds = array<i64: 32, 32>}, {pipeline_mode = #tpu.pipeline_mode<synchronous>, transform_indices = @transform_3, window_bounds = array<i64: 2, 32, 96>}, {pipeline_mode = #tpu.pipeline_mode<synchronous>, transform_indices = @transform_4, window_bounds = array<i64: 2, 32, 32>}, {pipeline_mode = #tpu.pipeline_mode<synchronous>, transform_indices = @transform_5, window_bounds = array<i64: 2, 32, 64>}, {pipeline_mode = #tpu.pipeline_mode<synchronous>, transform_indices = @transform_6, window_bounds = array<i64: 2, 64, 32>}, {pipeline_mode = #tpu.pipeline_mode<synchronous>, transform_indices = @transform_7, window_bounds = array<i64: 2, 8, 96>}, {pipeline_mode = #tpu.pipeline_mode<synchronous>, transform_indices = @transform_8, window_bounds = array<i64: 2, 32>}, {transform_indices = @transform_9, window_bounds = array<i64: 2, 64>}]} {
    %c0 = arith.constant 0 : index
    %c0_0 = arith.constant 0 : index
    %c0_1 = arith.constant 0 : index
    %0 = vector.load %arg1[%c0, %c0_0, %c0_1] : memref<2x8x32xf32, #tpu.memory_space<vmem>>, vector<2x8x32xf32>
    %1 = vector.shape_cast %0 : vector<2x8x32xf32> to vector<16x32xf32>
    %c0_2 = arith.constant 0 : index
    %c0_3 = arith.constant 0 : index
    %2 = vector.load %arg3[%c0_2, %c0_3] : memref<32x32xf32, #tpu.memory_space<vmem>>, vector<32x32xf32>
    %cst = arith.constant dense<0.000000e+00> : vector<16x32xf32>
    %3 = tpu.matmul %1, %2, %cst {dimension_numbers = #tpu.dot_dimension_numbers<[1], [0], [0], [1], [0, 0, 1, 1], [], []>} : vector<16x32xf32>, vector<32x32xf32>, vector<16x32xf32> -> vector<16x32xf32>
    %4 = vector.shape_cast %3 : vector<16x32xf32> to vector<2x8x32xf32>
    %c0_4 = arith.constant 0 : index
    %c0_5 = arith.constant 0 : index
    %5 = vector.load %arg2[%c0_4, %c0_5] : memref<8x32xf32, #tpu.memory_space<vmem>>, vector<8x32xf32>
    %6 = vector.shape_cast %5 : vector<8x32xf32> to vector<1x8x32xf32>
    %7 = vector.broadcast %6 : vector<1x8x32xf32> to vector<2x8x32xf32>
    %8 = arith.addf %4, %7 : vector<2x8x32xf32>
    %9 = vector.shape_cast %8 : vector<2x8x32xf32> to vector<16x32xf32>
    %c0_6 = arith.constant 0 : index
    %c0_7 = arith.constant 0 : index
    %c0_8 = arith.constant 0 : index
    %10 = vector.load %arg8[%c0_6, %c0_7, %c0_8] : memref<2x8x96xf32, #tpu.memory_space<vmem>>, vector<1x8x96xf32>
    %11 = vector.shape_cast %10 : vector<1x8x96xf32> to vector<8x96xf32>
    %12 = vector.extract_strided_slice %11 {offsets = [0, 0], sizes = [1, 96], strides = [1, 1]} : vector<8x96xf32> to vector<1x96xf32>
    %13 = vector.extract_strided_slice %11 {offsets = [1, 0], sizes = [1, 64], strides = [1, 1]} : vector<8x96xf32> to vector<1x64xf32>
    %14 = vector.extract_strided_slice %11 {offsets = [2, 0], sizes = [1, 32], strides = [1, 1]} : vector<8x96xf32> to vector<1x32xf32>
    %15 = vector.extract_strided_slice %11 {offsets = [3, 0], sizes = [1, 32], strides = [1, 1]} : vector<8x96xf32> to vector<1x32xf32>
    %16 = vector.extract_strided_slice %11 {offsets = [4, 0], sizes = [1, 32], strides = [1, 1]} : vector<8x96xf32> to vector<1x32xf32>
    %17 = vector.extract_strided_slice %11 {offsets = [5, 0], sizes = [1, 32], strides = [1, 1]} : vector<8x96xf32> to vector<1x32xf32>
    %18 = vector.extract_strided_slice %11 {offsets = [6, 0], sizes = [1, 32], strides = [1, 1]} : vector<8x96xf32> to vector<1x32xf32>
    %19 = vector.extract_strided_slice %11 {offsets = [7, 0], sizes = [1, 32], strides = [1, 1]} : vector<8x96xf32> to vector<1x32xf32>
    %c0_9 = arith.constant 0 : index
    %c0_10 = arith.constant 0 : index
    %c0_11 = arith.constant 0 : index
    %20 = vector.load %arg4[%c0_9, %c0_10, %c0_11] : memref<2x32x96xf32, #tpu.memory_space<vmem>>, vector<1x32x96xf32>
    %21 = vector.shape_cast %20 : vector<1x32x96xf32> to vector<32x96xf32>
    %cst_12 = arith.constant dense<0.000000e+00> : vector<16x96xf32>
    %22 = tpu.matmul %9, %21, %cst_12 {dimension_numbers = #tpu.dot_dimension_numbers<[1], [0], [0], [1], [0, 0, 1, 1], [], []>} : vector<16x32xf32>, vector<32x96xf32>, vector<16x96xf32> -> vector<16x96xf32>
    %23 = vector.broadcast %12 : vector<1x96xf32> to vector<16x96xf32>
    %24 = arith.addf %22, %23 : vector<16x96xf32>
    %25 = vector.shape_cast %24 : vector<16x96xf32> to vector<2x8x96xf32>
    %26 = vector.extract_strided_slice %25 {offsets = [0, 0, 0], sizes = [2, 8, 8], strides = [1, 1, 1]} : vector<2x8x96xf32> to vector<2x8x8xf32>
    %27 = vector.extract_strided_slice %25 {offsets = [0, 0, 32], sizes = [2, 8, 8], strides = [1, 1, 1]} : vector<2x8x96xf32> to vector<2x8x8xf32>
    %28 = vector.extract_strided_slice %25 {offsets = [0, 0, 64], sizes = [2, 8, 8], strides = [1, 1, 1]} : vector<2x8x96xf32> to vector<2x8x8xf32>
    %cst_13 = arith.constant 0.353553385 : f32
    %29 = vector.broadcast %cst_13 : f32 to vector<2x8x8xf32>
    %30 = arith.mulf %26, %29 : vector<2x8x8xf32>
    %cst_14 = arith.constant dense<0.000000e+00> : vector<2x8x8xf32>
    %31 = tpu.matmul %30, %27, %cst_14 {dimension_numbers = #tpu.dot_dimension_numbers<[2], [2], [1], [1], [0, 0, 0, 1, 1, 1], [0], [0]>} : vector<2x8x8xf32>, vector<2x8x8xf32>, vector<2x8x8xf32> -> vector<2x8x8xf32>
    %cst_15 = arith.constant dense<0xFF800000> : vector<2x8xf32>
    %32 = vector.multi_reduction <maximumf>, %31, %cst_15 [2] : vector<2x8x8xf32> to vector<2x8xf32>
    %33 = vector.shape_cast %32 : vector<2x8xf32> to vector<2x8x1xf32>
    %34 = vector.broadcast %33 : vector<2x8x1xf32> to vector<2x8x8xf32>
    %35 = arith.subf %31, %34 : vector<2x8x8xf32>
    %36 = math.exp %35 : vector<2x8x8xf32>
    %cst_16 = arith.constant dense<0.000000e+00> : vector<2x8xf32>
    %37 = vector.multi_reduction <add>, %36, %cst_16 [2] : vector<2x8x8xf32> to vector<2x8xf32>
    %38 = vector.shape_cast %37 : vector<2x8xf32> to vector<2x8x1xf32>
    %39 = tpu.reciprocal %38 {approx = true} : vector<2x8x1xf32> -> vector<2x8x1xf32>
    %40 = vector.broadcast %39 : vector<2x8x1xf32> to vector<2x8x8xf32>
    %41 = arith.mulf %36, %40 : vector<2x8x8xf32>
    %cst_17 = arith.constant dense<0.000000e+00> : vector<2x8x8xf32>
    %42 = tpu.matmul %41, %28, %cst_17 {dimension_numbers = #tpu.dot_dimension_numbers<[2], [1], [1], [2], [0, 0, 0, 1, 1, 2], [0], [0]>} : vector<2x8x8xf32>, vector<2x8x8xf32>, vector<2x8x8xf32> -> vector<2x8x8xf32>
    %43 = vector.extract_strided_slice %25 {offsets = [0, 0, 8], sizes = [2, 8, 8], strides = [1, 1, 1]} : vector<2x8x96xf32> to vector<2x8x8xf32>
    %44 = vector.extract_strided_slice %25 {offsets = [0, 0, 40], sizes = [2, 8, 8], strides = [1, 1, 1]} : vector<2x8x96xf32> to vector<2x8x8xf32>
    %45 = vector.extract_strided_slice %25 {offsets = [0, 0, 72], sizes = [2, 8, 8], strides = [1, 1, 1]} : vector<2x8x96xf32> to vector<2x8x8xf32>
    %cst_18 = arith.constant 0.353553385 : f32
    %46 = vector.broadcast %cst_18 : f32 to vector<2x8x8xf32>
    %47 = arith.mulf %43, %46 : vector<2x8x8xf32>
    %cst_19 = arith.constant dense<0.000000e+00> : vector<2x8x8xf32>
    %48 = tpu.matmul %47, %44, %cst_19 {dimension_numbers = #tpu.dot_dimension_numbers<[2], [2], [1], [1], [0, 0, 0, 1, 1, 1], [0], [0]>} : vector<2x8x8xf32>, vector<2x8x8xf32>, vector<2x8x8xf32> -> vector<2x8x8xf32>
    %cst_20 = arith.constant dense<0xFF800000> : vector<2x8xf32>
    %49 = vector.multi_reduction <maximumf>, %48, %cst_20 [2] : vector<2x8x8xf32> to vector<2x8xf32>
    %50 = vector.shape_cast %49 : vector<2x8xf32> to vector<2x8x1xf32>
    %51 = vector.broadcast %50 : vector<2x8x1xf32> to vector<2x8x8xf32>
    %52 = arith.subf %48, %51 : vector<2x8x8xf32>
    %53 = math.exp %52 : vector<2x8x8xf32>
    %cst_21 = arith.constant dense<0.000000e+00> : vector<2x8xf32>
    %54 = vector.multi_reduction <add>, %53, %cst_21 [2] : vector<2x8x8xf32> to vector<2x8xf32>
    %55 = vector.shape_cast %54 : vector<2x8xf32> to vector<2x8x1xf32>
    %56 = tpu.reciprocal %55 {approx = true} : vector<2x8x1xf32> -> vector<2x8x1xf32>
    %57 = vector.broadcast %56 : vector<2x8x1xf32> to vector<2x8x8xf32>
    %58 = arith.mulf %53, %57 : vector<2x8x8xf32>
    %cst_22 = arith.constant dense<0.000000e+00> : vector<2x8x8xf32>
    %59 = tpu.matmul %58, %45, %cst_22 {dimension_numbers = #tpu.dot_dimension_numbers<[2], [1], [1], [2], [0, 0, 0, 1, 1, 2], [0], [0]>} : vector<2x8x8xf32>, vector<2x8x8xf32>, vector<2x8x8xf32> -> vector<2x8x8xf32>
    %60 = vector.extract_strided_slice %25 {offsets = [0, 0, 16], sizes = [2, 8, 8], strides = [1, 1, 1]} : vector<2x8x96xf32> to vector<2x8x8xf32>
    %61 = vector.extract_strided_slice %25 {offsets = [0, 0, 48], sizes = [2, 8, 8], strides = [1, 1, 1]} : vector<2x8x96xf32> to vector<2x8x8xf32>
    %62 = vector.extract_strided_slice %25 {offsets = [0, 0, 80], sizes = [2, 8, 8], strides = [1, 1, 1]} : vector<2x8x96xf32> to vector<2x8x8xf32>
    %cst_23 = arith.constant 0.353553385 : f32
    %63 = vector.broadcast %cst_23 : f32 to vector<2x8x8xf32>
    %64 = arith.mulf %60, %63 : vector<2x8x8xf32>
    %cst_24 = arith.constant dense<0.000000e+00> : vector<2x8x8xf32>
    %65 = tpu.matmul %64, %61, %cst_24 {dimension_numbers = #tpu.dot_dimension_numbers<[2], [2], [1], [1], [0, 0, 0, 1, 1, 1], [0], [0]>} : vector<2x8x8xf32>, vector<2x8x8xf32>, vector<2x8x8xf32> -> vector<2x8x8xf32>
    %cst_25 = arith.constant dense<0xFF800000> : vector<2x8xf32>
    %66 = vector.multi_reduction <maximumf>, %65, %cst_25 [2] : vector<2x8x8xf32> to vector<2x8xf32>
    %67 = vector.shape_cast %66 : vector<2x8xf32> to vector<2x8x1xf32>
    %68 = vector.broadcast %67 : vector<2x8x1xf32> to vector<2x8x8xf32>
    %69 = arith.subf %65, %68 : vector<2x8x8xf32>
    %70 = math.exp %69 : vector<2x8x8xf32>
    %cst_26 = arith.constant dense<0.000000e+00> : vector<2x8xf32>
    %71 = vector.multi_reduction <add>, %70, %cst_26 [2] : vector<2x8x8xf32> to vector<2x8xf32>
    %72 = vector.shape_cast %71 : vector<2x8xf32> to vector<2x8x1xf32>
    %73 = tpu.reciprocal %72 {approx = true} : vector<2x8x1xf32> -> vector<2x8x1xf32>
    %74 = vector.broadcast %73 : vector<2x8x1xf32> to vector<2x8x8xf32>
    %75 = arith.mulf %70, %74 : vector<2x8x8xf32>
    %cst_27 = arith.constant dense<0.000000e+00> : vector<2x8x8xf32>
    %76 = tpu.matmul %75, %62, %cst_27 {dimension_numbers = #tpu.dot_dimension_numbers<[2], [1], [1], [2], [0, 0, 0, 1, 1, 2], [0], [0]>} : vector<2x8x8xf32>, vector<2x8x8xf32>, vector<2x8x8xf32> -> vector<2x8x8xf32>
    %77 = vector.extract_strided_slice %25 {offsets = [0, 0, 24], sizes = [2, 8, 8], strides = [1, 1, 1]} : vector<2x8x96xf32> to vector<2x8x8xf32>
    %78 = vector.extract_strided_slice %25 {offsets = [0, 0, 56], sizes = [2, 8, 8], strides = [1, 1, 1]} : vector<2x8x96xf32> to vector<2x8x8xf32>
    %79 = vector.extract_strided_slice %25 {offsets = [0, 0, 88], sizes = [2, 8, 8], strides = [1, 1, 1]} : vector<2x8x96xf32> to vector<2x8x8xf32>
    %cst_28 = arith.constant 0.353553385 : f32
    %80 = vector.broadcast %cst_28 : f32 to vector<2x8x8xf32>
    %81 = arith.mulf %77, %80 : vector<2x8x8xf32>
    %cst_29 = arith.constant dense<0.000000e+00> : vector<2x8x8xf32>
    %82 = tpu.matmul %81, %78, %cst_29 {dimension_numbers = #tpu.dot_dimension_numbers<[2], [2], [1], [1], [0, 0, 0, 1, 1, 1], [0], [0]>} : vector<2x8x8xf32>, vector<2x8x8xf32>, vector<2x8x8xf32> -> vector<2x8x8xf32>
    %cst_30 = arith.constant dense<0xFF800000> : vector<2x8xf32>
    %83 = vector.multi_reduction <maximumf>, %82, %cst_30 [2] : vector<2x8x8xf32> to vector<2x8xf32>
    %84 = vector.shape_cast %83 : vector<2x8xf32> to vector<2x8x1xf32>
    %85 = vector.broadcast %84 : vector<2x8x1xf32> to vector<2x8x8xf32>
    %86 = arith.subf %82, %85 : vector<2x8x8xf32>
    %87 = math.exp %86 : vector<2x8x8xf32>
    %cst_31 = arith.constant dense<0.000000e+00> : vector<2x8xf32>
    %88 = vector.multi_reduction <add>, %87, %cst_31 [2] : vector<2x8x8xf32> to vector<2x8xf32>
    %89 = vector.shape_cast %88 : vector<2x8xf32> to vector<2x8x1xf32>
    %90 = tpu.reciprocal %89 {approx = true} : vector<2x8x1xf32> -> vector<2x8x1xf32>
    %91 = vector.broadcast %90 : vector<2x8x1xf32> to vector<2x8x8xf32>
    %92 = arith.mulf %87, %91 : vector<2x8x8xf32>
    %cst_32 = arith.constant dense<0.000000e+00> : vector<2x8x8xf32>
    %93 = tpu.matmul %92, %79, %cst_32 {dimension_numbers = #tpu.dot_dimension_numbers<[2], [1], [1], [2], [0, 0, 0, 1, 1, 2], [0], [0]>} : vector<2x8x8xf32>, vector<2x8x8xf32>, vector<2x8x8xf32> -> vector<2x8x8xf32>
    %94 = tpu.concatenate %42, %59, %76, %93 in 2 : vector<2x8x8xf32>, vector<2x8x8xf32>, vector<2x8x8xf32>, vector<2x8x8xf32> -> vector<2x8x32xf32>
    %95 = vector.shape_cast %94 : vector<2x8x32xf32> to vector<16x32xf32>
    %c0_33 = arith.constant 0 : index
    %c0_34 = arith.constant 0 : index
    %c0_35 = arith.constant 0 : index
    %96 = vector.load %arg5[%c0_33, %c0_34, %c0_35] : memref<2x32x32xf32, #tpu.memory_space<vmem>>, vector<1x32x32xf32>
    %97 = vector.shape_cast %96 : vector<1x32x32xf32> to vector<32x32xf32>
    %cst_36 = arith.constant dense<0.000000e+00> : vector<16x32xf32>
    %98 = tpu.matmul %95, %97, %cst_36 {dimension_numbers = #tpu.dot_dimension_numbers<[1], [0], [0], [1], [0, 0, 1, 1], [], []>} : vector<16x32xf32>, vector<32x32xf32>, vector<16x32xf32> -> vector<16x32xf32>
    %99 = vector.broadcast %14 : vector<1x32xf32> to vector<16x32xf32>
    %100 = arith.addf %98, %99 : vector<16x32xf32>
    %101 = arith.addf %9, %100 : vector<16x32xf32>
    %cst_37 = arith.constant dense<0.000000e+00> : vector<16xf32>
    %102 = vector.multi_reduction <add>, %101, %cst_37 [1] : vector<16x32xf32> to vector<16xf32>
    %103 = vector.shape_cast %102 : vector<16xf32> to vector<16x1xf32>
    %cst_38 = arith.constant 3.200000e+01 : f32
    %104 = vector.broadcast %cst_38 : f32 to vector<16x1xf32>
    %105 = arith.divf %103, %104 : vector<16x1xf32>
    %106 = vector.broadcast %105 : vector<16x1xf32> to vector<16x32xf32>
    %107 = arith.subf %101, %106 : vector<16x32xf32>
    %108 = arith.mulf %107, %107 : vector<16x32xf32>
    %cst_39 = arith.constant dense<0.000000e+00> : vector<16xf32>
    %109 = vector.multi_reduction <add>, %108, %cst_39 [1] : vector<16x32xf32> to vector<16xf32>
    %110 = vector.shape_cast %109 : vector<16xf32> to vector<16x1xf32>
    %cst_40 = arith.constant 3.200000e+01 : f32
    %111 = vector.broadcast %cst_40 : f32 to vector<16x1xf32>
    %112 = arith.divf %110, %111 : vector<16x1xf32>
    %cst_41 = arith.constant 9.99999974E-6 : f32
    %113 = vector.broadcast %cst_41 : f32 to vector<16x1xf32>
    %114 = arith.addf %112, %113 : vector<16x1xf32>
    %115 = math.rsqrt %114 : vector<16x1xf32>
    %116 = vector.broadcast %115 : vector<16x1xf32> to vector<16x32xf32>
    %117 = arith.mulf %107, %116 : vector<16x32xf32>
    %118 = vector.broadcast %16 : vector<1x32xf32> to vector<16x32xf32>
    %119 = arith.mulf %117, %118 : vector<16x32xf32>
    %120 = vector.broadcast %17 : vector<1x32xf32> to vector<16x32xf32>
    %121 = arith.addf %119, %120 : vector<16x32xf32>
    %c0_42 = arith.constant 0 : index
    %c0_43 = arith.constant 0 : index
    %c0_44 = arith.constant 0 : index
    %122 = vector.load %arg6[%c0_42, %c0_43, %c0_44] : memref<2x32x64xf32, #tpu.memory_space<vmem>>, vector<1x32x64xf32>
    %123 = vector.shape_cast %122 : vector<1x32x64xf32> to vector<32x64xf32>
    %cst_45 = arith.constant dense<0.000000e+00> : vector<16x64xf32>
    %124 = tpu.matmul %121, %123, %cst_45 {dimension_numbers = #tpu.dot_dimension_numbers<[1], [0], [0], [1], [0, 0, 1, 1], [], []>} : vector<16x32xf32>, vector<32x64xf32>, vector<16x64xf32> -> vector<16x64xf32>
    %125 = vector.broadcast %13 : vector<1x64xf32> to vector<16x64xf32>
    %126 = arith.addf %124, %125 : vector<16x64xf32>
    %cst_46 = arith.constant 0.000000e+00 : f32
    %127 = vector.broadcast %cst_46 : f32 to vector<16x64xf32>
    %128 = arith.maximumf %126, %127 : vector<16x64xf32>
    %c0_47 = arith.constant 0 : index
    %c0_48 = arith.constant 0 : index
    %c0_49 = arith.constant 0 : index
    %129 = vector.load %arg7[%c0_47, %c0_48, %c0_49] : memref<2x64x32xf32, #tpu.memory_space<vmem>>, vector<1x64x32xf32>
    %130 = vector.shape_cast %129 : vector<1x64x32xf32> to vector<64x32xf32>
    %cst_50 = arith.constant dense<0.000000e+00> : vector<16x32xf32>
    %131 = tpu.matmul %128, %130, %cst_50 {dimension_numbers = #tpu.dot_dimension_numbers<[1], [0], [0], [1], [0, 0, 1, 1], [], []>} : vector<16x64xf32>, vector<64x32xf32>, vector<16x32xf32> -> vector<16x32xf32>
    %132 = vector.broadcast %15 : vector<1x32xf32> to vector<16x32xf32>
    %133 = arith.addf %131, %132 : vector<16x32xf32>
    %134 = arith.addf %121, %133 : vector<16x32xf32>
    %cst_51 = arith.constant dense<0.000000e+00> : vector<16xf32>
    %135 = vector.multi_reduction <add>, %134, %cst_51 [1] : vector<16x32xf32> to vector<16xf32>
    %136 = vector.shape_cast %135 : vector<16xf32> to vector<16x1xf32>
    %cst_52 = arith.constant 3.200000e+01 : f32
    %137 = vector.broadcast %cst_52 : f32 to vector<16x1xf32>
    %138 = arith.divf %136, %137 : vector<16x1xf32>
    %139 = vector.broadcast %138 : vector<16x1xf32> to vector<16x32xf32>
    %140 = arith.subf %134, %139 : vector<16x32xf32>
    %141 = arith.mulf %140, %140 : vector<16x32xf32>
    %cst_53 = arith.constant dense<0.000000e+00> : vector<16xf32>
    %142 = vector.multi_reduction <add>, %141, %cst_53 [1] : vector<16x32xf32> to vector<16xf32>
    %143 = vector.shape_cast %142 : vector<16xf32> to vector<16x1xf32>
    %cst_54 = arith.constant 3.200000e+01 : f32
    %144 = vector.broadcast %cst_54 : f32 to vector<16x1xf32>
    %145 = arith.divf %143, %144 : vector<16x1xf32>
    %cst_55 = arith.constant 9.99999974E-6 : f32
    %146 = vector.broadcast %cst_55 : f32 to vector<16x1xf32>
    %147 = arith.addf %145, %146 : vector<16x1xf32>
    %148 = math.rsqrt %147 : vector<16x1xf32>
    %149 = vector.broadcast %148 : vector<16x1xf32> to vector<16x32xf32>
    %150 = arith.mulf %140, %149 : vector<16x32xf32>
    %151 = vector.broadcast %18 : vector<1x32xf32> to vector<16x32xf32>
    %152 = arith.mulf %150, %151 : vector<16x32xf32>
    %153 = vector.broadcast %19 : vector<1x32xf32> to vector<16x32xf32>
    %154 = arith.addf %152, %153 : vector<16x32xf32>
    %c1 = arith.constant 1 : index
    %c0_56 = arith.constant 0 : index
    %c0_57 = arith.constant 0 : index
    %155 = vector.load %arg8[%c1, %c0_56, %c0_57] : memref<2x8x96xf32, #tpu.memory_space<vmem>>, vector<1x8x96xf32>
    %156 = vector.shape_cast %155 : vector<1x8x96xf32> to vector<8x96xf32>
    %157 = vector.extract_strided_slice %156 {offsets = [0, 0], sizes = [1, 96], strides = [1, 1]} : vector<8x96xf32> to vector<1x96xf32>
    %158 = vector.extract_strided_slice %156 {offsets = [1, 0], sizes = [1, 64], strides = [1, 1]} : vector<8x96xf32> to vector<1x64xf32>
    %159 = vector.extract_strided_slice %156 {offsets = [2, 0], sizes = [1, 32], strides = [1, 1]} : vector<8x96xf32> to vector<1x32xf32>
    %160 = vector.extract_strided_slice %156 {offsets = [3, 0], sizes = [1, 32], strides = [1, 1]} : vector<8x96xf32> to vector<1x32xf32>
    %161 = vector.extract_strided_slice %156 {offsets = [4, 0], sizes = [1, 32], strides = [1, 1]} : vector<8x96xf32> to vector<1x32xf32>
    %162 = vector.extract_strided_slice %156 {offsets = [5, 0], sizes = [1, 32], strides = [1, 1]} : vector<8x96xf32> to vector<1x32xf32>
    %163 = vector.extract_strided_slice %156 {offsets = [6, 0], sizes = [1, 32], strides = [1, 1]} : vector<8x96xf32> to vector<1x32xf32>
    %164 = vector.extract_strided_slice %156 {offsets = [7, 0], sizes = [1, 32], strides = [1, 1]} : vector<8x96xf32> to vector<1x32xf32>
    %c1_58 = arith.constant 1 : index
    %c0_59 = arith.constant 0 : index
    %c0_60 = arith.constant 0 : index
    %165 = vector.load %arg4[%c1_58, %c0_59, %c0_60] : memref<2x32x96xf32, #tpu.memory_space<vmem>>, vector<1x32x96xf32>
    %166 = vector.shape_cast %165 : vector<1x32x96xf32> to vector<32x96xf32>
    %cst_61 = arith.constant dense<0.000000e+00> : vector<16x96xf32>
    %167 = tpu.matmul %154, %166, %cst_61 {dimension_numbers = #tpu.dot_dimension_numbers<[1], [0], [0], [1], [0, 0, 1, 1], [], []>} : vector<16x32xf32>, vector<32x96xf32>, vector<16x96xf32> -> vector<16x96xf32>
    %168 = vector.broadcast %157 : vector<1x96xf32> to vector<16x96xf32>
    %169 = arith.addf %167, %168 : vector<16x96xf32>
    %170 = vector.shape_cast %169 : vector<16x96xf32> to vector<2x8x96xf32>
    %171 = vector.extract_strided_slice %170 {offsets = [0, 0, 0], sizes = [2, 8, 8], strides = [1, 1, 1]} : vector<2x8x96xf32> to vector<2x8x8xf32>
    %172 = vector.extract_strided_slice %170 {offsets = [0, 0, 32], sizes = [2, 8, 8], strides = [1, 1, 1]} : vector<2x8x96xf32> to vector<2x8x8xf32>
    %173 = vector.extract_strided_slice %170 {offsets = [0, 0, 64], sizes = [2, 8, 8], strides = [1, 1, 1]} : vector<2x8x96xf32> to vector<2x8x8xf32>
    %cst_62 = arith.constant 0.353553385 : f32
    %174 = vector.broadcast %cst_62 : f32 to vector<2x8x8xf32>
    %175 = arith.mulf %171, %174 : vector<2x8x8xf32>
    %cst_63 = arith.constant dense<0.000000e+00> : vector<2x8x8xf32>
    %176 = tpu.matmul %175, %172, %cst_63 {dimension_numbers = #tpu.dot_dimension_numbers<[2], [2], [1], [1], [0, 0, 0, 1, 1, 1], [0], [0]>} : vector<2x8x8xf32>, vector<2x8x8xf32>, vector<2x8x8xf32> -> vector<2x8x8xf32>
    %cst_64 = arith.constant dense<0xFF800000> : vector<2x8xf32>
    %177 = vector.multi_reduction <maximumf>, %176, %cst_64 [2] : vector<2x8x8xf32> to vector<2x8xf32>
    %178 = vector.shape_cast %177 : vector<2x8xf32> to vector<2x8x1xf32>
    %179 = vector.broadcast %178 : vector<2x8x1xf32> to vector<2x8x8xf32>
    %180 = arith.subf %176, %179 : vector<2x8x8xf32>
    %181 = math.exp %180 : vector<2x8x8xf32>
    %cst_65 = arith.constant dense<0.000000e+00> : vector<2x8xf32>
    %182 = vector.multi_reduction <add>, %181, %cst_65 [2] : vector<2x8x8xf32> to vector<2x8xf32>
    %183 = vector.shape_cast %182 : vector<2x8xf32> to vector<2x8x1xf32>
    %184 = tpu.reciprocal %183 {approx = true} : vector<2x8x1xf32> -> vector<2x8x1xf32>
    %185 = vector.broadcast %184 : vector<2x8x1xf32> to vector<2x8x8xf32>
    %186 = arith.mulf %181, %185 : vector<2x8x8xf32>
    %cst_66 = arith.constant dense<0.000000e+00> : vector<2x8x8xf32>
    %187 = tpu.matmul %186, %173, %cst_66 {dimension_numbers = #tpu.dot_dimension_numbers<[2], [1], [1], [2], [0, 0, 0, 1, 1, 2], [0], [0]>} : vector<2x8x8xf32>, vector<2x8x8xf32>, vector<2x8x8xf32> -> vector<2x8x8xf32>
    %188 = vector.extract_strided_slice %170 {offsets = [0, 0, 8], sizes = [2, 8, 8], strides = [1, 1, 1]} : vector<2x8x96xf32> to vector<2x8x8xf32>
    %189 = vector.extract_strided_slice %170 {offsets = [0, 0, 40], sizes = [2, 8, 8], strides = [1, 1, 1]} : vector<2x8x96xf32> to vector<2x8x8xf32>
    %190 = vector.extract_strided_slice %170 {offsets = [0, 0, 72], sizes = [2, 8, 8], strides = [1, 1, 1]} : vector<2x8x96xf32> to vector<2x8x8xf32>
    %cst_67 = arith.constant 0.353553385 : f32
    %191 = vector.broadcast %cst_67 : f32 to vector<2x8x8xf32>
    %192 = arith.mulf %188, %191 : vector<2x8x8xf32>
    %cst_68 = arith.constant dense<0.000000e+00> : vector<2x8x8xf32>
    %193 = tpu.matmul %192, %189, %cst_68 {dimension_numbers = #tpu.dot_dimension_numbers<[2], [2], [1], [1], [0, 0, 0, 1, 1, 1], [0], [0]>} : vector<2x8x8xf32>, vector<2x8x8xf32>, vector<2x8x8xf32> -> vector<2x8x8xf32>
    %cst_69 = arith.constant dense<0xFF800000> : vector<2x8xf32>
    %194 = vector.multi_reduction <maximumf>, %193, %cst_69 [2] : vector<2x8x8xf32> to vector<2x8xf32>
    %195 = vector.shape_cast %194 : vector<2x8xf32> to vector<2x8x1xf32>
    %196 = vector.broadcast %195 : vector<2x8x1xf32> to vector<2x8x8xf32>
    %197 = arith.subf %193, %196 : vector<2x8x8xf32>
    %198 = math.exp %197 : vector<2x8x8xf32>
    %cst_70 = arith.constant dense<0.000000e+00> : vector<2x8xf32>
    %199 = vector.multi_reduction <add>, %198, %cst_70 [2] : vector<2x8x8xf32> to vector<2x8xf32>
    %200 = vector.shape_cast %199 : vector<2x8xf32> to vector<2x8x1xf32>
    %201 = tpu.reciprocal %200 {approx = true} : vector<2x8x1xf32> -> vector<2x8x1xf32>
    %202 = vector.broadcast %201 : vector<2x8x1xf32> to vector<2x8x8xf32>
    %203 = arith.mulf %198, %202 : vector<2x8x8xf32>
    %cst_71 = arith.constant dense<0.000000e+00> : vector<2x8x8xf32>
    %204 = tpu.matmul %203, %190, %cst_71 {dimension_numbers = #tpu.dot_dimension_numbers<[2], [1], [1], [2], [0, 0, 0, 1, 1, 2], [0], [0]>} : vector<2x8x8xf32>, vector<2x8x8xf32>, vector<2x8x8xf32> -> vector<2x8x8xf32>
    %205 = vector.extract_strided_slice %170 {offsets = [0, 0, 16], sizes = [2, 8, 8], strides = [1, 1, 1]} : vector<2x8x96xf32> to vector<2x8x8xf32>
    %206 = vector.extract_strided_slice %170 {offsets = [0, 0, 48], sizes = [2, 8, 8], strides = [1, 1, 1]} : vector<2x8x96xf32> to vector<2x8x8xf32>
    %207 = vector.extract_strided_slice %170 {offsets = [0, 0, 80], sizes = [2, 8, 8], strides = [1, 1, 1]} : vector<2x8x96xf32> to vector<2x8x8xf32>
    %cst_72 = arith.constant 0.353553385 : f32
    %208 = vector.broadcast %cst_72 : f32 to vector<2x8x8xf32>
    %209 = arith.mulf %205, %208 : vector<2x8x8xf32>
    %cst_73 = arith.constant dense<0.000000e+00> : vector<2x8x8xf32>
    %210 = tpu.matmul %209, %206, %cst_73 {dimension_numbers = #tpu.dot_dimension_numbers<[2], [2], [1], [1], [0, 0, 0, 1, 1, 1], [0], [0]>} : vector<2x8x8xf32>, vector<2x8x8xf32>, vector<2x8x8xf32> -> vector<2x8x8xf32>
    %cst_74 = arith.constant dense<0xFF800000> : vector<2x8xf32>
    %211 = vector.multi_reduction <maximumf>, %210, %cst_74 [2] : vector<2x8x8xf32> to vector<2x8xf32>
    %212 = vector.shape_cast %211 : vector<2x8xf32> to vector<2x8x1xf32>
    %213 = vector.broadcast %212 : vector<2x8x1xf32> to vector<2x8x8xf32>
    %214 = arith.subf %210, %213 : vector<2x8x8xf32>
    %215 = math.exp %214 : vector<2x8x8xf32>
    %cst_75 = arith.constant dense<0.000000e+00> : vector<2x8xf32>
    %216 = vector.multi_reduction <add>, %215, %cst_75 [2] : vector<2x8x8xf32> to vector<2x8xf32>
    %217 = vector.shape_cast %216 : vector<2x8xf32> to vector<2x8x1xf32>
    %218 = tpu.reciprocal %217 {approx = true} : vector<2x8x1xf32> -> vector<2x8x1xf32>
    %219 = vector.broadcast %218 : vector<2x8x1xf32> to vector<2x8x8xf32>
    %220 = arith.mulf %215, %219 : vector<2x8x8xf32>
    %cst_76 = arith.constant dense<0.000000e+00> : vector<2x8x8xf32>
    %221 = tpu.matmul %220, %207, %cst_76 {dimension_numbers = #tpu.dot_dimension_numbers<[2], [1], [1], [2], [0, 0, 0, 1, 1, 2], [0], [0]>} : vector<2x8x8xf32>, vector<2x8x8xf32>, vector<2x8x8xf32> -> vector<2x8x8xf32>
    %222 = vector.extract_strided_slice %170 {offsets = [0, 0, 24], sizes = [2, 8, 8], strides = [1, 1, 1]} : vector<2x8x96xf32> to vector<2x8x8xf32>
    %223 = vector.extract_strided_slice %170 {offsets = [0, 0, 56], sizes = [2, 8, 8], strides = [1, 1, 1]} : vector<2x8x96xf32> to vector<2x8x8xf32>
    %224 = vector.extract_strided_slice %170 {offsets = [0, 0, 88], sizes = [2, 8, 8], strides = [1, 1, 1]} : vector<2x8x96xf32> to vector<2x8x8xf32>
    %cst_77 = arith.constant 0.353553385 : f32
    %225 = vector.broadcast %cst_77 : f32 to vector<2x8x8xf32>
    %226 = arith.mulf %222, %225 : vector<2x8x8xf32>
    %cst_78 = arith.constant dense<0.000000e+00> : vector<2x8x8xf32>
    %227 = tpu.matmul %226, %223, %cst_78 {dimension_numbers = #tpu.dot_dimension_numbers<[2], [2], [1], [1], [0, 0, 0, 1, 1, 1], [0], [0]>} : vector<2x8x8xf32>, vector<2x8x8xf32>, vector<2x8x8xf32> -> vector<2x8x8xf32>
    %cst_79 = arith.constant dense<0xFF800000> : vector<2x8xf32>
    %228 = vector.multi_reduction <maximumf>, %227, %cst_79 [2] : vector<2x8x8xf32> to vector<2x8xf32>
    %229 = vector.shape_cast %228 : vector<2x8xf32> to vector<2x8x1xf32>
    %230 = vector.broadcast %229 : vector<2x8x1xf32> to vector<2x8x8xf32>
    %231 = arith.subf %227, %230 : vector<2x8x8xf32>
    %232 = math.exp %231 : vector<2x8x8xf32>
    %cst_80 = arith.constant dense<0.000000e+00> : vector<2x8xf32>
    %233 = vector.multi_reduction <add>, %232, %cst_80 [2] : vector<2x8x8xf32> to vector<2x8xf32>
    %234 = vector.shape_cast %233 : vector<2x8xf32> to vector<2x8x1xf32>
    %235 = tpu.reciprocal %234 {approx = true} : vector<2x8x1xf32> -> vector<2x8x1xf32>
    %236 = vector.broadcast %235 : vector<2x8x1xf32> to vector<2x8x8xf32>
    %237 = arith.mulf %232, %236 : vector<2x8x8xf32>
    %cst_81 = arith.constant dense<0.000000e+00> : vector<2x8x8xf32>
    %238 = tpu.matmul %237, %224, %cst_81 {dimension_numbers = #tpu.dot_dimension_numbers<[2], [1], [1], [2], [0, 0, 0, 1, 1, 2], [0], [0]>} : vector<2x8x8xf32>, vector<2x8x8xf32>, vector<2x8x8xf32> -> vector<2x8x8xf32>
    %239 = tpu.concatenate %187, %204, %221, %238 in 2 : vector<2x8x8xf32>, vector<2x8x8xf32>, vector<2x8x8xf32>, vector<2x8x8xf32> -> vector<2x8x32xf32>
    %240 = vector.shape_cast %239 : vector<2x8x32xf32> to vector<16x32xf32>
    %c1_82 = arith.constant 1 : index
    %c0_83 = arith.constant 0 : index
    %c0_84 = arith.constant 0 : index
    %241 = vector.load %arg5[%c1_82, %c0_83, %c0_84] : memref<2x32x32xf32, #tpu.memory_space<vmem>>, vector<1x32x32xf32>
    %242 = vector.shape_cast %241 : vector<1x32x32xf32> to vector<32x32xf32>
    %cst_85 = arith.constant dense<0.000000e+00> : vector<16x32xf32>
    %243 = tpu.matmul %240, %242, %cst_85 {dimension_numbers = #tpu.dot_dimension_numbers<[1], [0], [0], [1], [0, 0, 1, 1], [], []>} : vector<16x32xf32>, vector<32x32xf32>, vector<16x32xf32> -> vector<16x32xf32>
    %244 = vector.broadcast %159 : vector<1x32xf32> to vector<16x32xf32>
    %245 = arith.addf %243, %244 : vector<16x32xf32>
    %246 = arith.addf %154, %245 : vector<16x32xf32>
    %cst_86 = arith.constant dense<0.000000e+00> : vector<16xf32>
    %247 = vector.multi_reduction <add>, %246, %cst_86 [1] : vector<16x32xf32> to vector<16xf32>
    %248 = vector.shape_cast %247 : vector<16xf32> to vector<16x1xf32>
    %cst_87 = arith.constant 3.200000e+01 : f32
    %249 = vector.broadcast %cst_87 : f32 to vector<16x1xf32>
    %250 = arith.divf %248, %249 : vector<16x1xf32>
    %251 = vector.broadcast %250 : vector<16x1xf32> to vector<16x32xf32>
    %252 = arith.subf %246, %251 : vector<16x32xf32>
    %253 = arith.mulf %252, %252 : vector<16x32xf32>
    %cst_88 = arith.constant dense<0.000000e+00> : vector<16xf32>
    %254 = vector.multi_reduction <add>, %253, %cst_88 [1] : vector<16x32xf32> to vector<16xf32>
    %255 = vector.shape_cast %254 : vector<16xf32> to vector<16x1xf32>
    %cst_89 = arith.constant 3.200000e+01 : f32
    %256 = vector.broadcast %cst_89 : f32 to vector<16x1xf32>
    %257 = arith.divf %255, %256 : vector<16x1xf32>
    %cst_90 = arith.constant 9.99999974E-6 : f32
    %258 = vector.broadcast %cst_90 : f32 to vector<16x1xf32>
    %259 = arith.addf %257, %258 : vector<16x1xf32>
    %260 = math.rsqrt %259 : vector<16x1xf32>
    %261 = vector.broadcast %260 : vector<16x1xf32> to vector<16x32xf32>
    %262 = arith.mulf %252, %261 : vector<16x32xf32>
    %263 = vector.broadcast %161 : vector<1x32xf32> to vector<16x32xf32>
    %264 = arith.mulf %262, %263 : vector<16x32xf32>
    %265 = vector.broadcast %162 : vector<1x32xf32> to vector<16x32xf32>
    %266 = arith.addf %264, %265 : vector<16x32xf32>
    %c1_91 = arith.constant 1 : index
    %c0_92 = arith.constant 0 : index
    %c0_93 = arith.constant 0 : index
    %267 = vector.load %arg6[%c1_91, %c0_92, %c0_93] : memref<2x32x64xf32, #tpu.memory_space<vmem>>, vector<1x32x64xf32>
    %268 = vector.shape_cast %267 : vector<1x32x64xf32> to vector<32x64xf32>
    %cst_94 = arith.constant dense<0.000000e+00> : vector<16x64xf32>
    %269 = tpu.matmul %266, %268, %cst_94 {dimension_numbers = #tpu.dot_dimension_numbers<[1], [0], [0], [1], [0, 0, 1, 1], [], []>} : vector<16x32xf32>, vector<32x64xf32>, vector<16x64xf32> -> vector<16x64xf32>
    %270 = vector.broadcast %158 : vector<1x64xf32> to vector<16x64xf32>
    %271 = arith.addf %269, %270 : vector<16x64xf32>
    %cst_95 = arith.constant 0.000000e+00 : f32
    %272 = vector.broadcast %cst_95 : f32 to vector<16x64xf32>
    %273 = arith.maximumf %271, %272 : vector<16x64xf32>
    %c1_96 = arith.constant 1 : index
    %c0_97 = arith.constant 0 : index
    %c0_98 = arith.constant 0 : index
    %274 = vector.load %arg7[%c1_96, %c0_97, %c0_98] : memref<2x64x32xf32, #tpu.memory_space<vmem>>, vector<1x64x32xf32>
    %275 = vector.shape_cast %274 : vector<1x64x32xf32> to vector<64x32xf32>
    %cst_99 = arith.constant dense<0.000000e+00> : vector<16x32xf32>
    %276 = tpu.matmul %273, %275, %cst_99 {dimension_numbers = #tpu.dot_dimension_numbers<[1], [0], [0], [1], [0, 0, 1, 1], [], []>} : vector<16x64xf32>, vector<64x32xf32>, vector<16x32xf32> -> vector<16x32xf32>
    %277 = vector.broadcast %160 : vector<1x32xf32> to vector<16x32xf32>
    %278 = arith.addf %276, %277 : vector<16x32xf32>
    %279 = arith.addf %266, %278 : vector<16x32xf32>
    %cst_100 = arith.constant dense<0.000000e+00> : vector<16xf32>
    %280 = vector.multi_reduction <add>, %279, %cst_100 [1] : vector<16x32xf32> to vector<16xf32>
    %281 = vector.shape_cast %280 : vector<16xf32> to vector<16x1xf32>
    %cst_101 = arith.constant 3.200000e+01 : f32
    %282 = vector.broadcast %cst_101 : f32 to vector<16x1xf32>
    %283 = arith.divf %281, %282 : vector<16x1xf32>
    %284 = vector.broadcast %283 : vector<16x1xf32> to vector<16x32xf32>
    %285 = arith.subf %279, %284 : vector<16x32xf32>
    %286 = arith.mulf %285, %285 : vector<16x32xf32>
    %cst_102 = arith.constant dense<0.000000e+00> : vector<16xf32>
    %287 = vector.multi_reduction <add>, %286, %cst_102 [1] : vector<16x32xf32> to vector<16xf32>
    %288 = vector.shape_cast %287 : vector<16xf32> to vector<16x1xf32>
    %cst_103 = arith.constant 3.200000e+01 : f32
    %289 = vector.broadcast %cst_103 : f32 to vector<16x1xf32>
    %290 = arith.divf %288, %289 : vector<16x1xf32>
    %cst_104 = arith.constant 9.99999974E-6 : f32
    %291 = vector.broadcast %cst_104 : f32 to vector<16x1xf32>
    %292 = arith.addf %290, %291 : vector<16x1xf32>
    %293 = math.rsqrt %292 : vector<16x1xf32>
    %294 = vector.broadcast %293 : vector<16x1xf32> to vector<16x32xf32>
    %295 = arith.mulf %285, %294 : vector<16x32xf32>
    %296 = vector.broadcast %163 : vector<1x32xf32> to vector<16x32xf32>
    %297 = arith.mulf %295, %296 : vector<16x32xf32>
    %298 = vector.broadcast %164 : vector<1x32xf32> to vector<16x32xf32>
    %299 = arith.addf %297, %298 : vector<16x32xf32>
    %c0_105 = arith.constant 0 : index
    %c0_106 = arith.constant 0 : index
    %300 = vector.load %arg9[%c0_105, %c0_106] : memref<2x32xf32, #tpu.memory_space<vmem>>, vector<2x32xf32>
    %301 = vector.extract_strided_slice %300 {offsets = [0, 0], sizes = [1, 32], strides = [1, 1]} : vector<2x32xf32> to vector<1x32xf32>
    %302 = vector.extract_strided_slice %300 {offsets = [1, 0], sizes = [1, 32], strides = [1, 1]} : vector<2x32xf32> to vector<1x32xf32>
    %cst_107 = arith.constant dense<0.000000e+00> : vector<16xf32>
    %303 = vector.multi_reduction <add>, %299, %cst_107 [1] : vector<16x32xf32> to vector<16xf32>
    %304 = vector.shape_cast %303 : vector<16xf32> to vector<16x1xf32>
    %cst_108 = arith.constant 3.200000e+01 : f32
    %305 = vector.broadcast %cst_108 : f32 to vector<16x1xf32>
    %306 = arith.divf %304, %305 : vector<16x1xf32>
    %307 = vector.broadcast %306 : vector<16x1xf32> to vector<16x32xf32>
    %308 = arith.subf %299, %307 : vector<16x32xf32>
    %309 = arith.mulf %308, %308 : vector<16x32xf32>
    %cst_109 = arith.constant dense<0.000000e+00> : vector<16xf32>
    %310 = vector.multi_reduction <add>, %309, %cst_109 [1] : vector<16x32xf32> to vector<16xf32>
    %311 = vector.shape_cast %310 : vector<16xf32> to vector<16x1xf32>
    %cst_110 = arith.constant 3.200000e+01 : f32
    %312 = vector.broadcast %cst_110 : f32 to vector<16x1xf32>
    %313 = arith.divf %311, %312 : vector<16x1xf32>
    %cst_111 = arith.constant 9.99999974E-6 : f32
    %314 = vector.broadcast %cst_111 : f32 to vector<16x1xf32>
    %315 = arith.addf %313, %314 : vector<16x1xf32>
    %316 = math.rsqrt %315 : vector<16x1xf32>
    %317 = vector.broadcast %316 : vector<16x1xf32> to vector<16x32xf32>
    %318 = arith.mulf %308, %317 : vector<16x32xf32>
    %319 = vector.broadcast %301 : vector<1x32xf32> to vector<16x32xf32>
    %320 = arith.mulf %318, %319 : vector<16x32xf32>
    %321 = vector.broadcast %302 : vector<1x32xf32> to vector<16x32xf32>
    %322 = arith.addf %320, %321 : vector<16x32xf32>
    %323 = vector.shape_cast %322 : vector<16x32xf32> to vector<2x8x32xf32>
    %cst_112 = arith.constant dense<0.000000e+00> : vector<2x32xf32>
    %324 = vector.multi_reduction <add>, %323, %cst_112 [1] : vector<2x8x32xf32> to vector<2x32xf32>
    %cst_113 = arith.constant 8.000000e+00 : f32
    %325 = vector.broadcast %cst_113 : f32 to vector<2x32xf32>
    %326 = arith.divf %324, %325 : vector<2x32xf32>
    %c0_114 = arith.constant 0 : index
    %c0_115 = arith.constant 0 : index
    %327 = vector.load %arg10[%c0_114, %c0_115] : memref<2x64xf32, #tpu.memory_space<vmem>>, vector<2x32xf32>
    tpu.vector_store %arg10[%c0_114, %c0_115], %326 {strides = array<i32>} : memref<2x64xf32, #tpu.memory_space<vmem>>, vector<2x32xf32>,
    %cst_116 = arith.constant dense<0xFF800000> : vector<2x32xf32>
    %328 = vector.multi_reduction <maximumf>, %323, %cst_116 [1] : vector<2x8x32xf32> to vector<2x32xf32>
    %c0_117 = arith.constant 0 : index
    %c32 = arith.constant 32 : index
    %329 = vector.load %arg10[%c0_117, %c32] : memref<2x64xf32, #tpu.memory_space<vmem>>, vector<2x32xf32>
    tpu.vector_store %arg10[%c0_117, %c32], %328 {strides = array<i32>} : memref<2x64xf32, #tpu.memory_space<vmem>>, vector<2x32xf32>,
    return
  }
  func.func @transform_0(%arg0: i32) -> (i32, i32, i32) {
    %c0_i32 = arith.constant 0 : i32
    %c0_i32_0 = arith.constant 0 : i32
    %c0_i32_1 = arith.constant 0 : i32
    return %arg0, %c0_i32, %c0_i32_0 : i32, i32, i32
  }
  func.func @transform_1(%arg0: i32) -> (i32, i32) {
    %c0_i32 = arith.constant 0 : i32
    %c0_i32_0 = arith.constant 0 : i32
    %c0_i32_1 = arith.constant 0 : i32
    return %c0_i32, %c0_i32_0 : i32, i32
  }
  func.func @transform_2(%arg0: i32) -> (i32, i32) {
    %c0_i32 = arith.constant 0 : i32
    %c0_i32_0 = arith.constant 0 : i32
    %c0_i32_1 = arith.constant 0 : i32
    return %c0_i32, %c0_i32_0 : i32, i32
  }
  func.func @transform_3(%arg0: i32) -> (i32, i32, i32) {
    %c0_i32 = arith.constant 0 : i32
    %c0_i32_0 = arith.constant 0 : i32
    %c0_i32_1 = arith.constant 0 : i32
    %c0_i32_2 = arith.constant 0 : i32
    return %c0_i32, %c0_i32_0, %c0_i32_1 : i32, i32, i32
  }
  func.func @transform_4(%arg0: i32) -> (i32, i32, i32) {
    %c0_i32 = arith.constant 0 : i32
    %c0_i32_0 = arith.constant 0 : i32
    %c0_i32_1 = arith.constant 0 : i32
    %c0_i32_2 = arith.constant 0 : i32
    return %c0_i32, %c0_i32_0, %c0_i32_1 : i32, i32, i32
  }
  func.func @transform_5(%arg0: i32) -> (i32, i32, i32) {
    %c0_i32 = arith.constant 0 : i32
    %c0_i32_0 = arith.constant 0 : i32
    %c0_i32_1 = arith.constant 0 : i32
    %c0_i32_2 = arith.constant 0 : i32
    return %c0_i32, %c0_i32_0, %c0_i32_1 : i32, i32, i32
  }
  func.func @transform_6(%arg0: i32) -> (i32, i32, i32) {
    %c0_i32 = arith.constant 0 : i32
    %c0_i32_0 = arith.constant 0 : i32
    %c0_i32_1 = arith.constant 0 : i32
    %c0_i32_2 = arith.constant 0 : i32
    return %c0_i32, %c0_i32_0, %c0_i32_1 : i32, i32, i32
  }
  func.func @transform_7(%arg0: i32) -> (i32, i32, i32) {
    %c0_i32 = arith.constant 0 : i32
    %c0_i32_0 = arith.constant 0 : i32
    %c0_i32_1 = arith.constant 0 : i32
    %c0_i32_2 = arith.constant 0 : i32
    return %c0_i32, %c0_i32_0, %c0_i32_1 : i32, i32, i32
  }
  func.func @transform_8(%arg0: i32) -> (i32, i32) {
    %c0_i32 = arith.constant 0 : i32
    %c0_i32_0 = arith.constant 0 : i32
    %c0_i32_1 = arith.constant 0 : i32
    return %c0_i32, %c0_i32_0 : i32, i32
  }
  func.func @transform_9(%arg0: i32) -> (i32, i32) {
    %c0_i32 = arith.constant 0 : i32
    %c0_i32_0 = arith.constant 0 : i32
    return %arg0, %c0_i32 : i32, i32
  }
}

</mosaic_0001>

<bundles_post_ra>
// kernel: tpu_custom_call.1
= control target key start
LH: loop header
LB: loop body
LE: loop exit
PB: predicated region body
PF: predicated region fallthrough
CT: control target
= control target key end

     0   :  { %14 = vsyncpa [#allocation3], 0  ;;  %s5253_s0 = inlined_call_operand.hbm [shape: f32[2,8,32], index: 0, kind: input, shape index: {}]   ;;  %s5254_s1 = inlined_call_operand.hbm [shape: f32[8,32], index: 1, kind: input, shape index: {}]   ;;  %s5255_s2 = inlined_call_operand.hbm [shape: f32[32,32], index: 2, kind: input, shape index: {}]   ;;  %s5256_s3 = inlined_call_operand.vmem [shape: f32[2,32,96], index: 3, kind: input, shape index: {}]   ;;  %s5257_s4 = inlined_call_operand.vmem [shape: f32[2,32,32], index: 4, kind: input, shape index: {}]   ;;  %s5258_s5 = inlined_call_operand.vmem [shape: f32[2,32,64], index: 5, kind: input, shape index: {}]   ;;  %s5259_s6 = inlined_call_operand.vmem [shape: f32[2,64,32], index: 6, kind: input, shape index: {}]   ;;  %s5260_s7 = inlined_call_operand.hbm [shape: f32[2,8,96], index: 7, kind: input, shape index: {}]   ;;  %s5261_s8 = inlined_call_operand.vmem [shape: f32[2,32], index: 8, kind: input, shape index: {}]   ;;  %s5262_s9 = inlined_call_operand.hbm [shape: f32[2,64], index: 9, kind: output, shape index: {}]  }
   0x1   :  { %15 = vsyncpa [#allocation6], 0 }
   0x2   :  { %16 = vsyncpa [#allocation9], 0 }
   0x3   :  { %17 = vsyncpa [#allocation4], 0  ;;  %s4581_s30 = smov [#allocation5]   ;;  %s4582_s11 = smov [#allocation2]  }
   0x4   :  { %s36_s10 = sshll.u32 %s4581_s30, 4  ;;  %s23_s12 = sshll.u32 %s4582_s11, 4  ;;  %s37_s10 = int_to_ptr.vmem [resolvable:$true] %s36_s10  ;;  %s24_s12 = int_to_ptr.vmem [resolvable:$true] %s23_s12 }
   0x5   :  { %s4481_s13 = scalar_lea.vmem %s37_s10, 128  ;;  %p4486_p1 = scmp.lt.s32.totalorder %s37_s10, %s37_s10 }
   0x6   :  { %p4482_p0 = scmp.ne.s32.totalorder %s37_s10, %s4481_s13  ;;  %p4487_p2 = scmp.lt.s32.totalorder %s4481_s13, %s4481_s13 }
   0x8   :  { %p4488_p3 = por %p4487_p2, %p4486_p1 }
   0xa   :  { %p4489_p4 = pnand %p4488_p3, %p4482_p0 }
   0xc   :  { %4492 = shalt.err (!%p4489_p4)
}
   0xd   :  { %39 = dma.hbm_to_vmem [thread:$0]  %s5254_s1, 128, %s37_s10, [#allocation6]  }
   0xe   :  { %s4501_s16 = scalar_lea.vmem %s24_s12, 256  ;;  %p4506_p6 = scmp.lt.s32.totalorder %s24_s12, %s24_s12 }
   0xf   :  { %p4502_p5 = scmp.ne.s32.totalorder %s24_s12, %s4501_s16  ;;  %p4507_p7 = scmp.lt.s32.totalorder %s4501_s16, %s4501_s16 }
  0x11   :  { %p4508_p8 = por %p4507_p7, %p4506_p6 }
  0x13   :  { %p4509_p9 = pnand %p4508_p8, %p4502_p5 }
  0x15   :  { %4512 = shalt.err (!%p4509_p9)
}
  0x16   :  { %s4583_s17 = smov 128   ;;  %s4584_s18 = smov 8  }
  0x17   :  { %29 = dma.hbm_to_vmem [thread:$0]  %s5253_s0, 256, %s24_s12, [#allocation3], %s4583_s17, %s4583_s17, %s4584_s18  }
  0x18   :  { %s4585_s21 = smov [#allocation7]   ;;  %s4586_s23 = smov [#allocation8]  }
  0x19   :  { %s45_s22 = sshll.u32 %s4585_s21, 4  ;;  %s65_s24 = sshll.u32 %s4586_s23, 4  ;;  %s46_s22 = int_to_ptr.vmem [resolvable:$true] %s45_s22  ;;  %s66_s24 = int_to_ptr.vmem [resolvable:$true] %s65_s24 }
  0x1a   :  { %s4521_s1 = scalar_lea.vmem %s46_s22, 512  ;;  %p4526_p11 = scmp.lt.s32.totalorder %s46_s22, %s46_s22 }
  0x1b   :  { %p4522_p10 = scmp.ne.s32.totalorder %s46_s22, %s4521_s1  ;;  %p4527_p12 = scmp.lt.s32.totalorder %s4521_s1, %s4521_s1 }
  0x1d   :  { %p4528_p13 = por %p4527_p12, %p4526_p11 }
  0x1f   :  { %p4529_p0 = pnand %p4528_p13, %p4522_p10 }
  0x21   :  { %4532 = shalt.err (!%p4529_p0)
}
  0x22   :  { %51 = dma.hbm_to_vmem [thread:$0]  %s5255_s2, 512, %s46_s22, [#allocation6], %s4583_s17, %s4583_s17, %s4584_s18  }
  0x23   :  { %s4541_s27 = scalar_lea.vmem %s66_s24, 256  ;;  %p4546_p2 = scmp.lt.s32.totalorder %s66_s24, %s66_s24 }
  0x24   :  { %p4542_p1 = scmp.ne.s32.totalorder %s66_s24, %s4541_s27  ;;  %p4547_p3 = scmp.lt.s32.totalorder %s4541_s27, %s4541_s27 }
  0x26   :  { %p4548_p4 = por %p4547_p3, %p4546_p2 }
  0x28   :  { %p4549_p5 = pnand %p4548_p4, %p4542_p1 }
  0x2a   :  { %4552 = shalt.err (!%p4549_p5)
}
  0x2b   :  { %71 = dma.hbm_to_vmem [thread:$0]  %s5260_s7, 256, %s66_s24, [#allocation9], %s4583_s17, %s4583_s17, %s4584_s18  }
  0x2c   :  { %4573 = dma.done.wait [#allocation3], 256  }
  0x2d   :  { %4574 = vsyncadd [#allocation3], 4294967040 }
  0x2e   :  { %4575 = dma.done.wait [#allocation6], 640  }
  0x2f   :  { %4576 = vsyncadd [#allocation6], 4294966656 }
  0x30   :  { %4577 = dma.done.wait [#allocation9], 256  }
  0x31   :  { %4578 = vsyncadd [#allocation9], 4294967040  ;;  %vm92_vm0 = vcmask 261120   ;;  %v91_v0 = vld [vmem:[#allocation7 + $0x18] sm:$0xff]  ;;  %v90_v1 = vld [vmem:[#allocation7 + $0x10] sm:$0xff]  ;;  %v4587_v15 = vmov 0.0   ;;  %v182_v16 = vlaneseq }
  0x32   :  { %4091 = vmatprep.subr.mxu1 %v91_v0  ;;  %v86_v2 = vld [vmem:[#allocation2] sm:$0xff]  ;;  %v88_v4 = vld [vmem:[#allocation7] sm:$0xff]  ;;  %v87_v5 = vld [vmem:[#allocation2 + $0x8] sm:$0xff]  ;;  %4113 = vmatprep.subr.mxu0 %v4587_v15  ;;  %vm4588_vm1 = vmmov 0   ;;  %s4589_s14 = smov 96   ;;  %vm272_vm2 = vcmask 64512  }
  0x33   :  { %4092 = vmatpush3.msra.mxu1 %v91_v0  ;;  %v89_v3 = vld [vmem:[#allocation7 + $0x8] sm:$0xff]  ;;  %4099 = vmatprep.mubr.msk.f32.mxu1 %vm92_vm0, %v86_v2  ;;  %v181_v6 = vld [vmem:[%s5256_s3 + $0x18] sm:$0xff]  ;;  %v180_v7 = vld [vmem:[%s5256_s3 + $0x10] sm:$0xff]  ;;  %v4693_v17 = vshrl.u32 %v182_v16, 7  ;;  %s4590_s15 = smov 64   ;;  %s4591_s16 = smov 120  }
  0x34   :  { %4093 = vmatprep.subr.mxu1 %v90_v1  ;;  %v179_v8 = vld [vmem:[%s5256_s3 + $0x8] sm:$0xff]  ;;  %v178_v9 = vld [vmem:[%s5256_s3] sm:$0xff]  ;;  %v174_v11 = vld [vmem:[#allocation5] sm:$0xff]  ;;  %4115 = vmatprep.mubr.msk.f32.mxu0 %vm4588_vm1, %v4587_v15  ;;  %s4592_s17 = smov 88   ;;  %s4593_s19 = smov 56   ;;  %vm1616_vm3 = vcmask 130048  }
  0x35   :  { %4094 = vmatpush3.msra.mxu1 %v90_v1  ;;  %v4700_v18 = vsub.s32 0, %v4693_v17  ;;  %v4702_v19 = vld [vmem:[#allocation8] sm:$0xff]  ;;  %s4594_s20 = smov 80   ;;  %s4595_s21 = smov 112   ;;  %vm1619_vm4 = vcmask 195584   ;;  %vm1855_vm5 = vcmask 523264  }
  0x36   :  { %4095 = vmatprep.subr.mxu1 %v89_v3  ;;  %s4596_s22 = smov 48   ;;  %s4597_s23 = smov 72   ;;  %vm3835_vm6 = vcmask 1041409   ;;  %vm3838_vm7 = vcmask 254976   ;;  %vm3860_vm8 = vcmask 517376  }
  0x37   :  { %4096 = vmatpush3.msra.mxu1 %v89_v3  ;;  %v185_v21 = vrot.slane %v4702_v19, %v4700_v18  ;;  %s4598_s24 = smov 104   ;;  %s4599_s1 = smov 40  }
  0x38   :  { %4097 = vmatprep.subr.mxu1 %v88_v4  ;;  %s4600_s25 = smov 16   ;;  %s4601_s10 = smov 24  }
  0x39   :  { %4098 = vmatpush3.msra.mxu1 %v88_v4 }
  0x3a   :  { %4100 = vmatmul.mubr.msk.f32.vlgmr.msra.gmra.mxu1 %vm92_vm0, %v87_v5  ;;  %4102 = vmatprep.subr.mxu1 %v181_v6 }
  0x3b   :  { %4103 = vmatpush3.msra.mxu1 %v181_v6 }
  0x3c   :  { %4104 = vmatprep.subr.mxu1 %v180_v7 }
  0x3d   :  { %4105 = vmatpush3.msra.mxu1 %v180_v7 }
  0x3e   :  { %4106 = vmatprep.subr.mxu1 %v179_v8 }
  0x3f   :  { %4107 = vmatpush3.msra.mxu1 %v179_v8 }
  0x40   :  { %4108 = vmatprep.subr.mxu1 %v178_v9 }
  0x41   :  { %4109 = vmatpush3.msra.mxu1 %v178_v9 }
  0x42   :  { %4118 = vmatprep.subr.mxu1 %v4587_v15 }
  0xfa   :  { %v4101_v10 = vpop.f32.mrf.mxu1 }
  0xfb   :  { %v4685_v14 = vadd.f32 %v4101_v10, %v174_v11 }
  0xfc   :  { %v165_v12 = vpop.f32.mrf.mxu1 }
  0xfd   :  { %v4683_v13 = vadd.f32 %v174_v11, %v165_v12 }
  0xff   :  { %4110 = vmatprep.mubr.msk.f32.mxu1 %vm92_vm0, %v4683_v13 }
 0x100   :  { %4111 = vmatmul.mubr.msk.f32.vlgmr.msra.gmra.mxu1 %vm92_vm0, %v4685_v14 }
 0x101   :  { %4120 = vmatprep.mubr.msk.f32.mxu1 %vm4588_vm1, %v4587_v15 }
 0x1c0   :  { %v4112_v20 = vpop.f32.mrf.mxu1 }
 0x1c1   :  { %v4710_v24 = vadd.f32 %v4112_v20, %v185_v21 }
 0x1c2   :  { %v258_v22 = vpop.f32.mrf.mxu1 }
 0x1c3   :  { %v4706_v23 = vadd.f32 %v258_v22, %v185_v21  ;;  %v4725_v28 = vmul.f32 0.35355338, %v4710_v24 }
 0x1c5   :  { %270 = vrot.lane.b32.xlu0 %v4706_v23, %s4589_s14  ;;  %v4716_v26 = vmul.f32 0.35355338, %v4706_v23 }
 0x1c9   :  { %349 = vrot.lane.b32.xlu0 %v4710_v24, %s4589_s14 }
 0x237   :  { %v271_v25 = vpop.permute.xlu0 %270 }
 0x238   :  { %4114 = vmatpush3.xpose.msk.msra.mxu0 %vm272_vm2, %v271_v25 }
 0x239   :  { %4123 = vmatprep.subr.mxu0 %v4587_v15 }
 0x23b   :  { %v350_v27 = vpop.permute.xlu0 %349  ;;  %4116 = vmatmul.mubr.msk.f32.vlgmr.msra.gmra.mxu0 %vm272_vm2, %v4716_v26 }
 0x23c   :  { %4119 = vmatpush3.xpose.msk.msra.mxu1 %vm272_vm2, %v350_v27  ;;  %4125 = vmatprep.mubr.msk.f32.mxu0 %vm4588_vm1, %v4587_v15 }
 0x23d   :  { %4128 = vmatprep.subr.mxu1 %v4587_v15 }
 0x23f   :  { %4121 = vmatmul.mubr.msk.f32.vlgmr.msra.gmra.mxu1 %vm272_vm2, %v4725_v28 }
 0x240   :  { %4130 = vmatprep.mubr.msk.f32.mxu1 %vm4588_vm1, %v4587_v15 }
 0x2fb   :  { %v344_v29 = vpop.f32.mrf.mxu0 }
 0x2fc   :  { %v426_v30 = vsel %vm272_vm2, %v344_v29, -inf }
 0x2fd   :  { %427 = vmax.xlane.f32.xlu1 %v426_v30  ;;  %v4117_v31 = vpop.f32.mrf.mxu0 }
 0x2ff   :  { %v422_v32 = vpop.f32.mrf.mxu1 }
 0x300   :  { %v429_v33 = vsel %vm272_vm2, %v422_v32, -inf }
 0x301   :  { %v4122_v34 = vpop.f32.mrf.mxu1  ;;  %430 = vmax.xlane.f32.xlu1 %v429_v33 }
 0x386   :  { %v428_v35 = vpop.xlane.xlu1 %427 }
 0x387   :  { %v432_v36 = vsub.f32 %v344_v29, %v428_v35 }
 0x389   :  { %v434_v37 = vmul.f32 1.442695, %v432_v36 }
 0x38a   :  { %v431_v38 = vpop.xlane.xlu1 %430 }
 0x38b   :  { %4389 = vpow2.f32 %v434_v37  ;;  %v433_v39 = vsub.f32 %v422_v32, %v431_v38 }
 0x38d   :  { %v436_v40 = vmul.f32 1.442695, %v433_v39 }
 0x38f   :  { %4391 = vpow2.f32 %v436_v40 }
 0x398   :  { %v4390_v41 = vpop.eup %4389 }
 0x399   :  { %v438_v42 = vsel %vm272_vm2, %v4390_v41, 0.0 }
 0x39a   :  { %439 = vadd.xlane.f32.xlu0 %v438_v42 }
 0x39c   :  { %v4392_v43 = vpop.eup %4391 }
 0x39d   :  { %v441_v44 = vsel %vm272_vm2, %v4392_v43, 0.0 }
 0x39e   :  { %442 = vadd.xlane.f32.xlu1 %v441_v44 }
 0x3af   :  { %448 = vrot.lane.b32.xlu1 %v4706_v23, %s4590_s15 }
 0x3b0   :  { %600 = vrot.lane.b32.xlu0 %v4716_v26, %s4591_s16 }
 0x3b3   :  { %524 = vrot.lane.b32.xlu1 %v4710_v24, %s4590_s15 }
 0x3b7   :  { %602 = vrot.lane.b32.xlu1 %v4706_v23, %s4592_s17 }
 0x3bb   :  { %680 = vrot.lane.b32.xlu1 %v4710_v24, %s4592_s17 }
 0x3bf   :  { %678 = vrot.lane.b32.xlu1 %v4725_v28, %s4591_s16 }
 0x423   :  { %v440_v45 = vpop.xlane.xlu0 %439 }
 0x424   :  { %4393 = vrcp.f32 %v440_v45 }
 0x427   :  { %v443_v46 = vpop.xlane.xlu1 %442  ;;  %v601_v54 = vpop.permute.xlu0 %600 }
 0x428   :  { %4395 = vrcp.f32 %v443_v46 }
 0x42b   :  { %v449_v47 = vpop.permute.xlu1 %448 }
 0x42c   :  { %4124 = vmatpush3.msra.mxu0 %v449_v47 }
 0x42d   :  { %4133 = vmatprep.subr.mxu0 %v4587_v15 }
 0x42f   :  { %v525_v48 = vpop.permute.xlu1 %524 }
 0x430   :  { %4129 = vmatpush3.msra.mxu1 %v525_v48 }
 0x431   :  { %v4394_v49 = vpop.eup %4393  ;;  %4138 = vmatprep.subr.mxu1 %v4587_v15 }
 0x432   :  { %v446_v50 = vmul.f32 %v4394_v49, %v4390_v41 }
 0x433   :  { %v603_v51 = vpop.permute.xlu1 %602 }
 0x434   :  { %4126 = vmatmul.mubr.msk.f32.vlgmr.msra.gmra.mxu0 %vm272_vm2, %v446_v50 }
 0x435   :  { %v4396_v52 = vpop.eup %4395  ;;  %4134 = vmatpush3.xpose.msk.msra.mxu0 %vm272_vm2, %v603_v51  ;;  %4135 = vmatprep.mubr.msk.f32.mxu0 %vm4588_vm1, %v4587_v15 }
 0x436   :  { %v447_v53 = vmul.f32 %v4396_v52, %v4392_v43  ;;  %4143 = vmatprep.subr.mxu0 %v4587_v15 }
 0x437   :  { %v681_v55 = vpop.permute.xlu1 %680 }
 0x438   :  { %4131 = vmatmul.mubr.msk.f32.vlgmr.msra.gmra.mxu1 %vm272_vm2, %v447_v53  ;;  %4136 = vmatmul.mubr.msk.f32.vlgmr.msra.gmra.mxu0 %vm272_vm2, %v601_v54 }
 0x439   :  { %4139 = vmatpush3.xpose.msk.msra.mxu1 %vm272_vm2, %v681_v55  ;;  %4140 = vmatprep.mubr.msk.f32.mxu1 %vm4588_vm1, %v4587_v15 }
 0x43a   :  { %4148 = vmatprep.subr.mxu1 %v4587_v15  ;;  %4145 = vmatprep.mubr.msk.f32.mxu0 %vm4588_vm1, %v4587_v15 }
 0x43b   :  { %v679_v56 = vpop.permute.xlu1 %678 }
 0x43c   :  { %4141 = vmatmul.mubr.msk.f32.vlgmr.msra.gmra.mxu1 %vm272_vm2, %v679_v56 }
 0x43d   :  { %4150 = vmatprep.mubr.msk.f32.mxu1 %vm4588_vm1, %v4587_v15 }
 0x4f4   :  { %v4766_v57 = vpop.f32.mrf.mxu0 }
 0x4f6   :  { %v4127_v58 = vpop.f32.mrf.mxu0 }
 0x4f8   :  { %v4768_v59 = vpop.f32.mrf.mxu1  ;;  %v674_v60 = vpop.f32.mrf.mxu0 }
 0x4f9   :  { %v756_v61 = vsel %vm272_vm2, %v674_v60, -inf }
 0x4fa   :  { %v4132_v62 = vpop.f32.mrf.mxu1  ;;  %757 = vmax.xlane.f32.xlu1 %v756_v61  ;;  %v4137_v63 = vpop.f32.mrf.mxu0 }
 0x4fc   :  { %v752_v0 = vpop.f32.mrf.mxu1 }
 0x4fd   :  { %v759_v1 = vsel %vm272_vm2, %v752_v0, -inf }
 0x4fe   :  { %760 = vmax.xlane.f32.xlu0 %v759_v1  ;;  %v4142_v2 = vpop.f32.mrf.mxu1 }
 0x50b   :  { %778 = vrot.lane.b32.xlu1 %v4706_v23, %s4593_s19 }
 0x50f   :  { %932 = vrot.lane.b32.xlu1 %v4706_v23, %s4594_s20 }
 0x513   :  { %1010 = vrot.lane.b32.xlu1 %v4710_v24, %s4594_s20 }
 0x514   :  { %854 = vrot.lane.b32.xlu0 %v4710_v24, %s4593_s19 }
 0x518   :  { %930 = vrot.lane.b32.xlu0 %v4716_v26, %s4595_s21 }
 0x583   :  { %v758_v3 = vpop.xlane.xlu1 %757 }
 0x584   :  { %v762_v4 = vsub.f32 %v674_v60, %v758_v3 }
 0x586   :  { %v764_v8 = vmul.f32 1.442695, %v762_v4 }
 0x587   :  { %v761_v5 = vpop.xlane.xlu0 %760  ;;  %v779_v6 = vpop.permute.xlu1 %778 }
 0x588   :  { %v763_v7 = vsub.f32 %v752_v0, %v761_v5  ;;  %4144 = vmatpush3.msra.mxu0 %v779_v6 }
 0x589   :  { %4153 = vmatprep.subr.mxu0 %v4587_v15 }
 0x58a   :  { %v766_v9 = vmul.f32 1.442695, %v763_v7 }
 0x58b   :  { %v855_v10 = vpop.permute.xlu0 %854  ;;  %v933_v21 = vpop.permute.xlu1 %932 }
 0x58c   :  { %4397 = vpow2.f32 %v766_v9  ;;  %4149 = vmatpush3.msra.mxu1 %v855_v10 }
 0x58d   :  { %4158 = vmatprep.subr.mxu1 %v4587_v15  ;;  %4399 = vpow2.f32 %v764_v8 }
 0x58f   :  { %v1011_v22 = vpop.permute.xlu1 %1010  ;;  %v931_v34 = vpop.permute.xlu0 %930 }
 0x599   :  { %v4398_v11 = vpop.eup %4397 }
 0x59a   :  { %v771_v12 = vsel %vm272_vm2, %v4398_v11, 0.0  ;;  %v4400_v16 = vpop.eup %4399 }
 0x59b   :  { %772 = vadd.xlane.f32.xlu1 %v771_v12  ;;  %v768_v20 = vsel %vm272_vm2, %v4400_v16, 0.0 }
 0x59f   :  { %769 = vadd.xlane.f32.xlu1 %v768_v20 }
 0x5b0   :  { %1008 = vrot.lane.b32.xlu1 %v4725_v28, %s4595_s21 }
 0x624   :  { %v773_v25 = vpop.xlane.xlu1 %772 }
 0x625   :  { %4401 = vrcp.f32 %v773_v25 }
 0x628   :  { %v770_v27 = vpop.xlane.xlu1 %769 }
 0x629   :  { %4403 = vrcp.f32 %v770_v27 }
 0x62c   :  { %v1009_v33 = vpop.permute.xlu1 %1008 }
 0x632   :  { %v4402_v29 = vpop.eup %4401 }
 0x633   :  { %v777_v30 = vmul.f32 %v4402_v29, %v4398_v11 }
 0x635   :  { %4151 = vmatmul.mubr.msk.f32.vlgmr.msra.gmra.mxu1 %vm272_vm2, %v777_v30 }
 0x636   :  { %v4404_v31 = vpop.eup %4403  ;;  %4159 = vmatpush3.xpose.msk.msra.mxu1 %vm272_vm2, %v1011_v22  ;;  %4160 = vmatprep.mubr.msk.f32.mxu1 %vm4588_vm1, %v4587_v15 }
 0x637   :  { %v776_v32 = vmul.f32 %v4404_v31, %v4400_v16  ;;  %4168 = vmatprep.subr.mxu1 %v4587_v15 }
 0x639   :  { %4146 = vmatmul.mubr.msk.f32.vlgmr.msra.gmra.mxu0 %vm272_vm2, %v776_v32  ;;  %4161 = vmatmul.mubr.msk.f32.vlgmr.msra.gmra.mxu1 %vm272_vm2, %v1009_v33 }
 0x63a   :  { %4154 = vmatpush3.xpose.msk.msra.mxu0 %vm272_vm2, %v933_v21  ;;  %4155 = vmatprep.mubr.msk.f32.mxu0 %vm4588_vm1, %v4587_v15 }
 0x63b   :  { %4163 = vmatprep.subr.mxu0 %v4587_v15  ;;  %4170 = vmatprep.mubr.msk.f32.mxu1 %vm4588_vm1, %v4587_v15 }
 0x63d   :  { %4156 = vmatmul.mubr.msk.f32.vlgmr.msra.gmra.mxu0 %vm272_vm2, %v931_v34 }
 0x63e   :  { %4165 = vmatprep.mubr.msk.f32.mxu0 %vm4588_vm1, %v4587_v15 }
 0x6f5   :  { %v4804_v35 = vpop.f32.mrf.mxu1 }
 0x6f7   :  { %v4152_v36 = vpop.f32.mrf.mxu1 }
 0x6f9   :  { %v4806_v37 = vpop.f32.mrf.mxu0  ;;  %v1082_v38 = vpop.f32.mrf.mxu1 }
 0x6fa   :  { %v1089_v39 = vsel %vm272_vm2, %v1082_v38, -inf }
 0x6fb   :  { %1090 = vmax.xlane.f32.xlu1 %v1089_v39  ;;  %v4147_v40 = vpop.f32.mrf.mxu0  ;;  %v4162_v41 = vpop.f32.mrf.mxu1 }
 0x6fc   :  { %v1624_v40 = vld [vmem:[%s5257_s4 + $0x10] sm:$0xff]  ;;  %v1623_v41 = vld [vmem:[%s5257_s4 + $0x8] sm:$0xff] }
 0x6fd   :  { %v1004_v42 = vpop.f32.mrf.mxu0 }
 0x6fe   :  { %v1086_v43 = vsel %vm272_vm2, %v1004_v42, -inf }
 0x6ff   :  { %1087 = vmax.xlane.f32.xlu0 %v1086_v43  ;;  %v4157_v44 = vpop.f32.mrf.mxu0 }
 0x70c   :  { %1108 = vrot.lane.b32.xlu1 %v4706_v23, %s4596_s22 }
 0x710   :  { %1262 = vrot.lane.b32.xlu1 %v4706_v23, %s4597_s23 }
 0x714   :  { %1340 = vrot.lane.b32.xlu1 %v4710_v24, %s4597_s23 }
 0x718   :  { %1338 = vrot.lane.b32.xlu1 %v4725_v28, %s4598_s24 }
 0x784   :  { %v1091_v45 = vpop.xlane.xlu1 %1090 }
 0x785   :  { %v1093_v46 = vsub.f32 %v1082_v38, %v1091_v45 }
 0x787   :  { %v1096_v47 = vmul.f32 1.442695, %v1093_v46 }
 0x788   :  { %v1109_v48 = vpop.permute.xlu1 %1108  ;;  %v1088_v49 = vpop.xlane.xlu0 %1087 }
 0x789   :  { %4405 = vpow2.f32 %v1096_v47  ;;  %v1092_v50 = vsub.f32 %v1004_v42, %v1088_v49  ;;  %4164 = vmatpush3.msra.mxu0 %v1109_v48  ;;  %v1622_v42 = vld [vmem:[%s5257_s4] sm:$0xff] }
 0x78a   :  { %4173 = vmatprep.subr.mxu0 %v4587_v15 }
 0x78b   :  { %v1094_v51 = vmul.f32 1.442695, %v1092_v50 }
 0x78c   :  { %v1263_v58 = vpop.permute.xlu1 %1262 }
 0x78d   :  { %4407 = vpow2.f32 %v1094_v51 }
 0x790   :  { %v1341_v62 = vpop.permute.xlu1 %1340 }
 0x794   :  { %v1339_v1 = vpop.permute.xlu1 %1338 }
 0x796   :  { %v4406_v52 = vpop.eup %4405 }
 0x797   :  { %v1101_v53 = vsel %vm272_vm2, %v4406_v52, 0.0 }
 0x798   :  { %1102 = vadd.xlane.f32.xlu0 %v1101_v53 }
 0x79a   :  { %v4408_v54 = vpop.eup %4407 }
 0x79b   :  { %v1098_v55 = vsel %vm272_vm2, %v4408_v54, 0.0 }
 0x79c   :  { %1099 = vadd.xlane.f32.xlu0 %v1098_v55 }
 0x7b2   :  { %1184 = vrot.lane.b32.xlu0 %v4710_v24, %s4596_s22 }
 0x7b6   :  { %1260 = vrot.lane.b32.xlu0 %v4716_v26, %s4598_s24 }
 0x821   :  { %v1103_v28 = vpop.xlane.xlu0 %1102 }
 0x822   :  { %4409 = vrcp.f32 %v1103_v28 }
 0x825   :  { %v1100_v56 = vpop.xlane.xlu0 %1099 }
 0x826   :  { %4411 = vrcp.f32 %v1100_v56 }
 0x829   :  { %v1185_v60 = vpop.permute.xlu0 %1184 }
 0x82a   :  { %4169 = vmatpush3.msra.mxu1 %v1185_v60 }
 0x82b   :  { %4178 = vmatprep.subr.mxu1 %v4587_v15 }
 0x82d   :  { %v1261_v2 = vpop.permute.xlu0 %1260 }
 0x82f   :  { %v4410_v61 = vpop.eup %4409 }
 0x830   :  { %v1107_v63 = vmul.f32 %v4410_v61, %v4406_v52 }
 0x832   :  { %4171 = vmatmul.mubr.msk.f32.vlgmr.msra.gmra.mxu1 %vm272_vm2, %v1107_v63 }
 0x833   :  { %v4412_v0 = vpop.eup %4411  ;;  %4179 = vmatpush3.xpose.msk.msra.mxu1 %vm272_vm2, %v1341_v62  ;;  %4180 = vmatprep.mubr.msk.f32.mxu1 %vm4588_vm1, %v4587_v15 }
 0x834   :  { %v1106_v26 = vmul.f32 %v4412_v0, %v4408_v54  ;;  %4188 = vmatprep.subr.mxu1 %v4587_v15 }
 0x836   :  { %4166 = vmatmul.mubr.msk.f32.vlgmr.msra.gmra.mxu0 %vm272_vm2, %v1106_v26  ;;  %4181 = vmatmul.mubr.msk.f32.vlgmr.msra.gmra.mxu1 %vm272_vm2, %v1339_v1 }
 0x837   :  { %4174 = vmatpush3.xpose.msk.msra.mxu0 %vm272_vm2, %v1263_v58  ;;  %4175 = vmatprep.mubr.msk.f32.mxu0 %vm4588_vm1, %v4587_v15 }
 0x838   :  { %4183 = vmatprep.subr.mxu0 %v4587_v15  ;;  %4190 = vmatprep.mubr.msk.f32.mxu1 %vm4588_vm1, %v4587_v15 }
 0x83a   :  { %4176 = vmatmul.mubr.msk.f32.vlgmr.msra.gmra.mxu0 %vm272_vm2, %v1261_v2 }
 0x83b   :  { %4185 = vmatprep.mubr.msk.f32.mxu0 %vm4588_vm1, %v4587_v15 }
 0x8f2   :  { %v1256_v3 = vpop.f32.mrf.mxu1 }
 0x8f4   :  { %v4172_v4 = vpop.f32.mrf.mxu1 }
 0x8f6   :  { %v1180_v5 = vpop.f32.mrf.mxu0  ;;  %v1412_v6 = vpop.f32.mrf.mxu1 }
 0x8f7   :  { %v1419_v7 = vsel %vm272_vm2, %v1412_v6, -inf }
 0x8f8   :  { %1420 = vmax.xlane.f32.xlu1 %v1419_v7  ;;  %v4167_v8 = vpop.f32.mrf.mxu0  ;;  %v4182_v9 = vpop.f32.mrf.mxu1 }
 0x8fa   :  { %v1334_v10 = vpop.f32.mrf.mxu0 }
 0x8fb   :  { %v1416_v11 = vsel %vm272_vm2, %v1334_v10, -inf }
 0x8fc   :  { %1417 = vmax.xlane.f32.xlu0 %v1416_v11  ;;  %v4177_v12 = vpop.f32.mrf.mxu0 }
 0x8fd   :  { %v1754_v12 = vld [vmem:[%s5258_s5 + $0x10] sm:$0xff] }
 0x909   :  { %1438 = vrot.lane.b32.xlu1 %v4706_v23, %s4599_s1 }
 0x90d   :  { %1592 = vrot.lane.b32.xlu1 %v4806_v37, %s4584_s18 }
 0x911   :  { %1594 = vrot.lane.b32.xlu1 %v4804_v35, %s4584_s18 }
 0x915   :  { %1602 = vrot.lane.b32.xlu1 %v1256_v3, %s4600_s25 }
 0x981   :  { %v1421_v16 = vpop.xlane.xlu1 %1420 }
 0x982   :  { %v1423_v20 = vsub.f32 %v1412_v6, %v1421_v16  ;;  %v1753_v16 = vld [vmem:[%s5258_s5 + $0x8] sm:$0xff] }
 0x984   :  { %v1426_v21 = vmul.f32 1.442695, %v1423_v20  ;;  %v1752_v20 = vld [vmem:[%s5258_s5] sm:$0xff] }
 0x985   :  { %v1439_v22 = vpop.permute.xlu1 %1438  ;;  %v1418_v25 = vpop.xlane.xlu0 %1417 }
 0x986   :  { %4413 = vpow2.f32 %v1426_v21  ;;  %v1422_v27 = vsub.f32 %v1334_v10, %v1418_v25  ;;  %4184 = vmatpush3.msra.mxu0 %v1439_v22  ;;  %v1850_v21 = vld [vmem:[%s5259_s6 + $0x38] sm:$0xff]  ;;  %v1849_v22 = vld [vmem:[%s5259_s6 + $0x30] sm:$0xff]  ;;  %v1848_v25 = vld [vmem:[%s5259_s6 + $0x28] sm:$0xff] }
 0x988   :  { %v1424_v29 = vmul.f32 1.442695, %v1422_v27  ;;  %v1847_v27 = vld [vmem:[%s5259_s6 + $0x20] sm:$0xff] }
 0x989   :  { %v1593_v47 = vpop.permute.xlu1 %1592 }
 0x98a   :  { %4415 = vpow2.f32 %v1424_v29  ;;  %v1614_v51 = vsel %vm272_vm2, %v4766_v57, %v1593_v47  ;;  %v1628_v57 = vsub.s32 2, %v4693_v17  ;;  %v1844_v47 = vld [vmem:[%s5259_s6 + $0x8] sm:$0xff] }
 0x98c   :  { %v1629_v60 = vrot.slane %v4702_v19, %v1628_v57 }
 0x98d   :  { %v1595_v48 = vpop.permute.xlu1 %1594 }
 0x98e   :  { %v1615_v53 = vsel %vm272_vm2, %v4768_v59, %v1595_v48  ;;  %v1843_v48 = vld [vmem:[%s5259_s6] sm:$0xff] }
 0x991   :  { %v1603_v49 = vpop.permute.xlu1 %1602 }
 0x992   :  { %v1618_v28 = vsel %vm1616_vm3, %v1615_v53, %v1603_v49  ;;  %v4940_v49 = vsub.s32 1, %v4693_v17 }
 0x993   :  { %v4414_v23 = vpop.eup %4413 }
 0x994   :  { %v1431_v30 = vsel %vm272_vm2, %v4414_v23, 0.0 }
 0x995   :  { %1432 = vadd.xlane.f32.xlu0 %v1431_v30 }
 0x997   :  { %v4416_v31 = vpop.eup %4415 }
 0x998   :  { %v1428_v32 = vsel %vm272_vm2, %v4416_v31, 0.0 }
 0x999   :  { %1429 = vadd.xlane.f32.xlu0 %v1428_v32 }
 0x9af   :  { %1514 = vrot.lane.b32.xlu0 %v4710_v24, %s4599_s1  ;;  %v1625_v24 = vld [vmem:[%s5257_s4 + $0x18] sm:$0xff] }
 0x9b0   :  { %4193 = vmatprep.subr.mxu0 %v1625_v24 }
 0x9b3   :  { %1600 = vrot.lane.b32.xlu0 %v1180_v5, %s4600_s25 }
 0xa1e   :  { %v1433_v33 = vpop.xlane.xlu0 %1432 }
 0xa1f   :  { %4417 = vrcp.f32 %v1433_v33 }
 0xa22   :  { %v1430_v34 = vpop.xlane.xlu0 %1429 }
 0xa23   :  { %4419 = vrcp.f32 %v1430_v34  ;;  %v1742_v34 = vsub.s32 4, %v4693_v17 }
 0xa26   :  { %v1515_v35 = vpop.permute.xlu0 %1514 }
 0xa27   :  { %4189 = vmatpush3.msra.mxu1 %v1515_v35  ;;  %v1748_v35 = vsub.s32 5, %v4693_v17 }
 0xa2a   :  { %v1601_v50 = vpop.permute.xlu0 %1600 }
 0xa2b   :  { %v1617_v54 = vsel %vm1616_vm3, %v1614_v51, %v1601_v50  ;;  %v1759_v50 = vrot.slane %v4702_v19, %v4940_v49 }
 0xa2c   :  { %v4418_v36 = vpop.eup %4417 }
 0xa2d   :  { %v1437_v37 = vmul.f32 %v4418_v36, %v4414_v23  ;;  %v1743_v36 = vrot.slane %v4702_v19, %v1742_v34 }
 0xa2f   :  { %4191 = vmatmul.mubr.msk.f32.vlgmr.msra.gmra.mxu1 %vm272_vm2, %v1437_v37 }
 0xa30   :  { %v4420_v38 = vpop.eup %4419 }
 0xa31   :  { %v1436_v39 = vmul.f32 %v4420_v38, %v4416_v31 }
 0xa33   :  { %4186 = vmatmul.mubr.msk.f32.vlgmr.msra.gmra.mxu0 %vm272_vm2, %v1436_v39  ;;  %v1749_v39 = vrot.slane %v4702_v19, %v1748_v35 }
 0xa34   :  { %4194 = vmatpush3.msra.mxu0 %v1625_v24 }
 0xa35   :  { %4195 = vmatprep.subr.mxu0 %v1624_v40 }
 0xa36   :  { %4196 = vmatpush3.msra.mxu0 %v1624_v40 }
 0xa37   :  { %4197 = vmatprep.subr.mxu0 %v1623_v41 }
 0xa38   :  { %4198 = vmatpush3.msra.mxu0 %v1623_v41 }
 0xa39   :  { %4199 = vmatprep.subr.mxu0 %v1622_v42 }
 0xa3a   :  { %4200 = vmatpush3.msra.mxu0 %v1622_v42 }
 0xa3b   :  { %4215 = vmatprep.subr.mxu0 %v1850_v21 }
 0xaef   :  { %v1586_v43 = vpop.f32.mrf.mxu1 }
 0xaf0   :  { %1610 = vrot.lane.b32.xlu1 %v1586_v43, %s4601_s10 }
 0xaf1   :  { %v4192_v44 = vpop.f32.mrf.mxu1 }
 0xaf3   :  { %v1510_v45 = vpop.f32.mrf.mxu0 }
 0xaf4   :  { %1608 = vrot.lane.b32.xlu0 %v1510_v45, %s4601_s10  ;;  %v1846_v45 = vld [vmem:[%s5259_s6 + $0x18] sm:$0xff] }
 0xaf5   :  { %v4187_v46 = vpop.f32.mrf.mxu0 }
 0xaf6   :  { %v1845_v46 = vld [vmem:[%s5259_s6 + $0x10] sm:$0xff] }
 0xb62   :  { %v1611_v52 = vpop.permute.xlu1 %1610 }
 0xb63   :  { %v1621_v58 = vsel %vm1619_vm4, %v1618_v28, %v1611_v52 }
 0xb66   :  { %v1609_v55 = vpop.permute.xlu0 %1608 }
 0xb67   :  { %v1620_v56 = vsel %vm1619_vm4, %v1617_v54, %v1609_v55 }
 0xb68   :  { %4201 = vmatprep.mubr.msk.f32.mxu0 %vm92_vm0, %v1620_v56  ;;  %v1853_v56 = vsub.s32 3, %v4693_v17 }
 0xb69   :  { %4202 = vmatmul.mubr.msk.f32.vlgmr.msra.gmra.mxu0 %vm92_vm0, %v1621_v58 }
 0xb6a   :  { %4216 = vmatpush3.msra.mxu0 %v1850_v21  ;;  %v1854_v58 = vrot.slane %v4702_v19, %v1853_v56 }
 0xb6b   :  { %4217 = vmatprep.subr.mxu0 %v1849_v22 }
 0xb6c   :  { %4218 = vmatpush3.msra.mxu0 %v1849_v22 }
 0xb6d   :  { %4219 = vmatprep.subr.mxu0 %v1848_v25 }
 0xb6e   :  { %4220 = vmatpush3.msra.mxu0 %v1848_v25 }
 0xb6f   :  { %4221 = vmatprep.subr.mxu0 %v1847_v27 }
 0xb70   :  { %4222 = vmatpush3.msra.mxu0 %v1847_v27 }
 0xb71   :  { %4223 = vmatprep.subr.mxu0 %v1846_v45 }
 0xb72   :  { %4224 = vmatpush3.msra.mxu0 %v1846_v45 }
 0xb73   :  { %4225 = vmatprep.subr.mxu0 %v1845_v46 }
 0xb74   :  { %4226 = vmatpush3.msra.mxu0 %v1845_v46 }
 0xb75   :  { %4227 = vmatprep.subr.mxu0 %v1844_v47 }
 0xb76   :  { %4228 = vmatpush3.msra.mxu0 %v1844_v47 }
 0xb77   :  { %4229 = vmatprep.subr.mxu0 %v1843_v48 }
 0xb78   :  { %4230 = vmatpush3.msra.mxu0 %v1843_v48 }
 0xb79   :  { %4255 = vmatprep.subr.mxu0 %v4587_v15 }
 0xc29   :  { %v4203_v59 = vpop.f32.mrf.mxu0 }
 0xc2a   :  { %v1708_v61 = vadd.f32 %v4203_v59, %v1629_v60 }
 0xc2b   :  { %v1702_v62 = vpop.f32.mrf.mxu0 }
 0xc2c   :  { %v1703_v63 = vadd.f32 %v1702_v62, %v1629_v60  ;;  %v1712_v0 = vadd.f32 %v1708_v61, %v4685_v14 }
 0xc2e   :  { %v1716_v26 = vsel %vm92_vm0, %v1712_v0, 0.0  ;;  %v1711_v1 = vadd.f32 %v1703_v63, %v4683_v13  ;;  %v1755_v13 = vld [vmem:[%s5258_s5 + $0x18] sm:$0xff] }
 0xc2f   :  { %1717 = vadd.xlane.f32.xlu1 %v1716_v26  ;;  %4204 = vmatprep.subr.mxu1 %v1755_v13 }
 0xc30   :  { %v1713_v2 = vsel %vm92_vm0, %v1711_v1, 0.0  ;;  %4205 = vmatpush3.msra.mxu1 %v1755_v13  ;;  %v3915_v13 = vld [vmem:[%s5256_s3 + $0x30] sm:$0xff] }
 0xc31   :  { %1714 = vadd.xlane.f32.xlu0 %v1713_v2  ;;  %4206 = vmatprep.subr.mxu1 %v1754_v12 }
 0xc32   :  { %4207 = vmatpush3.msra.mxu1 %v1754_v12  ;;  %v3914_v12 = vld [vmem:[%s5256_s3 + $0x28] sm:$0xff] }
 0xc33   :  { %4208 = vmatprep.subr.mxu1 %v1753_v16 }
 0xc34   :  { %4209 = vmatpush3.msra.mxu1 %v1753_v16  ;;  %v3913_v16 = vld [vmem:[%s5256_s3 + $0x20] sm:$0xff] }
 0xc35   :  { %4210 = vmatprep.subr.mxu1 %v1752_v20 }
 0xc36   :  { %4211 = vmatpush3.msra.mxu1 %v1752_v20 }
 0xcb8   :  { %v1718_v3 = vpop.xlane.xlu1 %1717 }
 0xcb9   :  { %v1721_v4 = vmul.f32 0.03125, %v1718_v3 }
 0xcba   :  { %v1715_v5 = vpop.xlane.xlu0 %1714 }
 0xcbb   :  { %v1720_v6 = vmul.f32 0.03125, %v1715_v5  ;;  %v1723_v7 = vsub.f32 %v1712_v0, %v1721_v4 }
 0xcbd   :  { %v1722_v8 = vsub.f32 %v1711_v1, %v1720_v6  ;;  %v1725_v11 = vmul.f32 %v1723_v7, %v1723_v7 }
 0xcbf   :  { %v1724_v9 = vmul.f32 %v1722_v8, %v1722_v8  ;;  %v1729_v14 = vsel %vm92_vm0, %v1725_v11, 0.0 }
 0xcc1   :  { %v1726_v10 = vsel %vm92_vm0, %v1724_v9, 0.0 }
 0xcc2   :  { %1727 = vadd.xlane.f32.xlu0 %v1726_v10 }
 0xcc6   :  { %1730 = vadd.xlane.f32.xlu0 %v1729_v14  ;;  %v3916_v14 = vld [vmem:[%s5256_s3 + $0x38] sm:$0xff] }
 0xcc7   :  { %4234 = vmatprep.subr.mxu1 %v3916_v14 }
 0xd4b   :  { %v1728_v29 = vpop.xlane.xlu0 %1727 }
 0xd4c   :  { %v1732_v23 = vmul.f32 0.03125, %v1728_v29 }
 0xd4e   :  { %v1734_v30 = vadd.f32 1e-05, %v1732_v23  ;;  %v1967_v23 = vsub.s32 6, %v4693_v17 }
 0xd4f   :  { %v1731_v31 = vpop.xlane.xlu0 %1730 }
 0xd50   :  { %4421 = vrsqrt.f32 %v1734_v30  ;;  %v1733_v32 = vmul.f32 0.03125, %v1731_v31  ;;  %v1968_v31 = vrot.slane %v4702_v19, %v1967_v23 }
 0xd52   :  { %v1735_v33 = vadd.f32 1e-05, %v1733_v32  ;;  %v1973_v32 = vsub.s32 7, %v4693_v17 }
 0xd54   :  { %4423 = vrsqrt.f32 %v1735_v33 }
 0xd5d   :  { %v4422_v37 = vpop.eup %4421 }
 0xd5e   :  { %v1738_v38 = vmul.f32 %v4422_v37, %v1722_v8 }
 0xd60   :  { %v1744_v24 = vmul.f32 %v1743_v36, %v1738_v38 }
 0xd61   :  { %v4424_v40 = vpop.eup %4423 }
 0xd62   :  { %v1739_v41 = vmul.f32 %v4424_v40, %v1723_v7  ;;  %v1750_v42 = vadd.f32 %v1749_v39, %v1744_v24 }
 0xd64   :  { %v1745_v43 = vmul.f32 %v1743_v36, %v1739_v41  ;;  %4212 = vmatprep.mubr.msk.f32.mxu1 %vm92_vm0, %v1750_v42 }
 0xd66   :  { %v1751_v44 = vadd.f32 %v1749_v39, %v1745_v43  ;;  %v1974_v39 = vrot.slane %v4702_v19, %v1973_v32 }
 0xd68   :  { %4213 = vmatmul.mubr.msk.f32.vlgmr.msra.gmra.mxu1 %vm92_vm0, %v1751_v44 }
 0xd69   :  { %4235 = vmatpush3.msra.mxu1 %v3916_v14 }
 0xd6a   :  { %4236 = vmatprep.subr.mxu1 %v3915_v13 }
 0xd6b   :  { %4237 = vmatpush3.msra.mxu1 %v3915_v13 }
 0xd6c   :  { %4238 = vmatprep.subr.mxu1 %v3914_v12 }
 0xd6d   :  { %4239 = vmatpush3.msra.mxu1 %v3914_v12 }
 0xd6e   :  { %4240 = vmatprep.subr.mxu1 %v3913_v16 }
 0xd6f   :  { %4241 = vmatpush3.msra.mxu1 %v3913_v16 }
 0xd70   :  { %4245 = vmatprep.subr.mxu1 %v4587_v15 }
 0xe28   :  { %v4214_v51 = vpop.f32.mrf.mxu1 }
 0xe29   :  { %v1838_v52 = vadd.f32 %v4214_v51, %v1759_v50 }
 0xe2a   :  { %v1832_v53 = vpop.f32.mrf.mxu1 }
 0xe2b   :  { %v1833_v54 = vadd.f32 %v1832_v53, %v1759_v50  ;;  %v1842_v28 = vmax.f32 %v1838_v52, 0.0 }
 0xe2d   :  { %v1841_v55 = vmax.f32 %v1833_v54, 0.0 }
 0xe2f   :  { %4231 = vmatprep.mubr.msk.f32.mxu0 %vm1855_vm5, %v1841_v55 }
 0xe30   :  { %4232 = vmatmul.mubr.msk.f32.vlgmr.msra.gmra.mxu0 %vm1855_vm5, %v1842_v28 }
 0xe31   :  { %4257 = vmatprep.mubr.msk.f32.mxu0 %vm4588_vm1, %v4587_v15 }
 0xef0   :  { %v4233_v60 = vpop.f32.mrf.mxu0 }
 0xef1   :  { %v1934_v59 = vadd.f32 %v4233_v60, %v1854_v58 }
 0xef2   :  { %v1928_v61 = vpop.f32.mrf.mxu0 }
 0xef3   :  { %v1929_v62 = vadd.f32 %v1928_v61, %v1854_v58  ;;  %v1938_v63 = vadd.f32 %v1934_v59, %v1751_v44 }
 0xef5   :  { %v1942_v0 = vsel %vm92_vm0, %v1938_v63, 0.0  ;;  %v1937_v26 = vadd.f32 %v1929_v62, %v1750_v42  ;;  %v4987_v42 = vld [vmem:[#allocation8 + $0x8] sm:$0xff] }
 0xef6   :  { %1943 = vadd.xlane.f32.xlu0 %v1942_v0  ;;  %v1987_v43 = vrot.slane %v4987_v42, %v4700_v18 }
 0xef7   :  { %v1939_v1 = vsel %vm92_vm0, %v1937_v26, 0.0 }
 0xef8   :  { %1940 = vadd.xlane.f32.xlu1 %v1939_v1 }
 0xf7f   :  { %v1944_v2 = vpop.xlane.xlu0 %1943 }
 0xf80   :  { %v1946_v3 = vmul.f32 0.03125, %v1944_v2 }
 0xf81   :  { %v1941_v4 = vpop.xlane.xlu1 %1940 }
 0xf82   :  { %v1948_v5 = vsub.f32 %v1938_v63, %v1946_v3  ;;  %v1945_v6 = vmul.f32 0.03125, %v1941_v4 }
 0xf84   :  { %v1947_v7 = vsub.f32 %v1937_v26, %v1945_v6  ;;  %v1950_v8 = vmul.f32 %v1948_v5, %v1948_v5 }
 0xf86   :  { %v1954_v9 = vsel %vm92_vm0, %v1950_v8, 0.0  ;;  %v1949_v10 = vmul.f32 %v1947_v7, %v1947_v7 }
 0xf87   :  { %1955 = vadd.xlane.f32.xlu0 %v1954_v9 }
 0xf88   :  { %v1951_v11 = vsel %vm92_vm0, %v1949_v10, 0.0 }
 0xf89   :  { %1952 = vadd.xlane.f32.xlu1 %v1951_v11 }
0x1010   :  { %v1956_v20 = vpop.xlane.xlu0 %1955 }
0x1011   :  { %v1958_v21 = vmul.f32 0.03125, %v1956_v20 }
0x1012   :  { %v1953_v22 = vpop.xlane.xlu1 %1952 }
0x1013   :  { %v1960_v25 = vadd.f32 1e-05, %v1958_v21  ;;  %v1957_v27 = vmul.f32 0.03125, %v1953_v22 }
0x1015   :  { %4425 = vrsqrt.f32 %v1960_v25  ;;  %v1959_v29 = vadd.f32 1e-05, %v1957_v27 }
0x1017   :  { %4427 = vrsqrt.f32 %v1959_v29 }
0x1022   :  { %v4426_v30 = vpop.eup %4425 }
0x1023   :  { %v1964_v33 = vmul.f32 %v4426_v30, %v1948_v5 }
0x1024   :  { %v4428_v36 = vpop.eup %4427 }
0x1025   :  { %v1963_v37 = vmul.f32 %v4428_v36, %v1947_v7  ;;  %v1970_v38 = vmul.f32 %v1968_v31, %v1964_v33 }
0x1027   :  { %v1969_v24 = vmul.f32 %v1968_v31, %v1963_v37  ;;  %v4979_v41 = vadd.f32 %v1974_v39, %v1970_v38 }
0x1029   :  { %v4977_v40 = vadd.f32 %v1974_v39, %v1969_v24 }
0x102b   :  { %4242 = vmatprep.mubr.msk.f32.mxu1 %vm92_vm0, %v4977_v40 }
0x102c   :  { %4243 = vmatmul.mubr.msk.f32.vlgmr.msra.gmra.mxu1 %vm92_vm0, %v4979_v41 }
0x102d   :  { %4247 = vmatprep.mubr.msk.f32.mxu1 %vm4588_vm1, %v4587_v15 }
0x10ec   :  { %v4244_v19 = vpop.f32.mrf.mxu1 }
0x10ed   :  { %v4991_v44 = vadd.f32 %v4244_v19, %v1987_v43 }
0x10ee   :  { %v2060_v45 = vpop.f32.mrf.mxu1 }
0x10ef   :  { %v4993_v46 = vadd.f32 %v2060_v45, %v1987_v43  ;;  %2150 = vrot.lane.b32.xlu0 %v4991_v44, %s4589_s14  ;;  %v5010_v51 = vmul.f32 0.35355338, %v4991_v44 }
0x10f1   :  { %2072 = vrot.lane.b32.xlu1 %v4993_v46, %s4589_s14  ;;  %v5001_v48 = vmul.f32 0.35355338, %v4993_v46 }
0x1161   :  { %v2151_v50 = vpop.permute.xlu0 %2150 }
0x1163   :  { %v2073_v47 = vpop.permute.xlu1 %2072 }
0x1164   :  { %4246 = vmatpush3.xpose.msk.msra.mxu1 %vm272_vm2, %v2073_v47 }
0x1165   :  { %4250 = vmatprep.subr.mxu1 %v4587_v15 }
0x1167   :  { %4248 = vmatmul.mubr.msk.f32.vlgmr.msra.gmra.mxu1 %vm272_vm2, %v5001_v48 }
0x1168   :  { %4251 = vmatpush3.xpose.msk.msra.mxu1 %vm272_vm2, %v2151_v50  ;;  %4252 = vmatprep.mubr.msk.f32.mxu1 %vm4588_vm1, %v4587_v15 }
0x1169   :  { %4260 = vmatprep.subr.mxu1 %v4587_v15 }
0x116b   :  { %4253 = vmatmul.mubr.msk.f32.vlgmr.msra.gmra.mxu1 %vm272_vm2, %v5010_v51 }
0x116c   :  { %4262 = vmatprep.mubr.msk.f32.mxu1 %vm4588_vm1, %v4587_v15 }
0x1227   :  { %v2145_v52 = vpop.f32.mrf.mxu1 }
0x1228   :  { %v2227_v53 = vsel %vm272_vm2, %v2145_v52, -inf }
0x1229   :  { %2228 = vmax.xlane.f32.xlu1 %v2227_v53  ;;  %v4249_v54 = vpop.f32.mrf.mxu1 }
0x122b   :  { %v2223_v55 = vpop.f32.mrf.mxu1 }
0x122c   :  { %v2230_v28 = vsel %vm272_vm2, %v2223_v55, -inf }
0x122d   :  { %2231 = vmax.xlane.f32.xlu0 %v2230_v28  ;;  %v4254_v58 = vpop.f32.mrf.mxu1 }
0x123a   :  { %2249 = vrot.lane.b32.xlu1 %v4993_v46, %s4590_s15 }
0x123e   :  { %2403 = vrot.lane.b32.xlu1 %v4993_v46, %s4592_s17 }
0x1242   :  { %2481 = vrot.lane.b32.xlu1 %v4991_v44, %s4592_s17  ;;  %s4603_s17 = smov [#allocation10]  }
0x1243   :  { %2325 = vrot.lane.b32.xlu0 %v4991_v44, %s4590_s15 }
0x12b2   :  { %v2229_v60 = vpop.xlane.xlu1 %2228 }
0x12b3   :  { %v2233_v59 = vsub.f32 %v2145_v52, %v2229_v60 }
0x12b5   :  { %v2235_v61 = vmul.f32 1.442695, %v2233_v59 }
0x12b6   :  { %v2250_v62 = vpop.permute.xlu1 %2249  ;;  %v2232_v63 = vpop.xlane.xlu0 %2231 }
0x12b7   :  { %4429 = vpow2.f32 %v2235_v61  ;;  %v2234_v0 = vsub.f32 %v2223_v55, %v2232_v63  ;;  %4256 = vmatpush3.msra.mxu0 %v2250_v62 }
0x12b8   :  { %4265 = vmatprep.subr.mxu0 %v4587_v15 }
0x12b9   :  { %v2237_v26 = vmul.f32 1.442695, %v2234_v0 }
0x12ba   :  { %v2326_v1 = vpop.permute.xlu0 %2325  ;;  %v2404_v6 = vpop.permute.xlu1 %2403 }
0x12bb   :  { %4431 = vpow2.f32 %v2237_v26  ;;  %4261 = vmatpush3.msra.mxu1 %v2326_v1 }
0x12bc   :  { %4270 = vmatprep.subr.mxu1 %v4587_v15 }
0x12be   :  { %v2482_v7 = vpop.permute.xlu1 %2481 }
0x12c4   :  { %v4430_v2 = vpop.eup %4429 }
0x12c5   :  { %v2239_v3 = vsel %vm272_vm2, %v4430_v2, 0.0 }
0x12c6   :  { %2240 = vadd.xlane.f32.xlu1 %v2239_v3 }
0x12c8   :  { %v4432_v4 = vpop.eup %4431 }
0x12c9   :  { %v2242_v5 = vsel %vm272_vm2, %v4432_v4, 0.0 }
0x12ca   :  { %2243 = vadd.xlane.f32.xlu0 %v2242_v5 }
0x12d7   :  { %2479 = vrot.lane.b32.xlu1 %v5010_v51, %s4591_s16 }
0x12e0   :  { %2401 = vrot.lane.b32.xlu0 %v5001_v48, %s4591_s16 }
0x134f   :  { %v2241_v8 = vpop.xlane.xlu1 %2240 }
0x1350   :  { %4433 = vrcp.f32 %v2241_v8 }
0x1353   :  { %v2244_v9 = vpop.xlane.xlu0 %2243  ;;  %v2480_v16 = vpop.permute.xlu1 %2479 }
0x1354   :  { %4435 = vrcp.f32 %v2244_v9 }
0x1357   :  { %v2402_v12 = vpop.permute.xlu0 %2401 }
0x135d   :  { %v4434_v10 = vpop.eup %4433 }
0x135e   :  { %v2247_v11 = vmul.f32 %v4434_v10, %v4430_v2 }
0x1360   :  { %4258 = vmatmul.mubr.msk.f32.vlgmr.msra.gmra.mxu0 %vm272_vm2, %v2247_v11 }
0x1361   :  { %v4436_v14 = vpop.eup %4435  ;;  %4266 = vmatpush3.xpose.msk.msra.mxu0 %vm272_vm2, %v2404_v6  ;;  %4267 = vmatprep.mubr.msk.f32.mxu0 %vm4588_vm1, %v4587_v15 }
0x1362   :  { %v2248_v13 = vmul.f32 %v4436_v14, %v4432_v4  ;;  %4275 = vmatprep.subr.mxu0 %v4587_v15 }
0x1364   :  { %4263 = vmatmul.mubr.msk.f32.vlgmr.msra.gmra.mxu1 %vm272_vm2, %v2248_v13  ;;  %4268 = vmatmul.mubr.msk.f32.vlgmr.msra.gmra.mxu0 %vm272_vm2, %v2402_v12 }
0x1365   :  { %4271 = vmatpush3.xpose.msk.msra.mxu1 %vm272_vm2, %v2482_v7  ;;  %4272 = vmatprep.mubr.msk.f32.mxu1 %vm4588_vm1, %v4587_v15 }
0x1366   :  { %4280 = vmatprep.subr.mxu1 %v4587_v15  ;;  %4277 = vmatprep.mubr.msk.f32.mxu0 %vm4588_vm1, %v4587_v15 }
0x1368   :  { %4273 = vmatmul.mubr.msk.f32.vlgmr.msra.gmra.mxu1 %vm272_vm2, %v2480_v16 }
0x1369   :  { %4282 = vmatprep.mubr.msk.f32.mxu1 %vm4588_vm1, %v4587_v15 }
0x1420   :  { %v5051_v20 = vpop.f32.mrf.mxu0 }
0x1422   :  { %v4259_v21 = vpop.f32.mrf.mxu0 }
0x1424   :  { %v5053_v22 = vpop.f32.mrf.mxu1  ;;  %v2475_v25 = vpop.f32.mrf.mxu0 }
0x1425   :  { %v2557_v27 = vsel %vm272_vm2, %v2475_v25, -inf }
0x1426   :  { %2558 = vmax.xlane.f32.xlu0 %v2557_v27  ;;  %v4264_v29 = vpop.f32.mrf.mxu1  ;;  %v4269_v30 = vpop.f32.mrf.mxu0 }
0x1428   :  { %v2553_v31 = vpop.f32.mrf.mxu1 }
0x1429   :  { %v2560_v33 = vsel %vm272_vm2, %v2553_v31, -inf }
0x142a   :  { %2561 = vmax.xlane.f32.xlu1 %v2560_v33  ;;  %v4274_v36 = vpop.f32.mrf.mxu1 }
0x143b   :  { %2579 = vrot.lane.b32.xlu1 %v4993_v46, %s4593_s19 }
0x143c   :  { %2655 = vrot.lane.b32.xlu0 %v4991_v44, %s4593_s19  ;;  %s3868_s19 = sshll.u32 %s4603_s17, 4  ;;  %s3869_s19 = int_to_ptr.vmem [resolvable:$true] %s3868_s19 }
0x143d   :  { %p4558_p7 = scmp.lt.s32.totalorder %s3869_s19, %s3869_s19 }
0x143f   :  { %2733 = vrot.lane.b32.xlu1 %v4993_v46, %s4594_s20 }
0x1443   :  { %2811 = vrot.lane.b32.xlu1 %v4991_v44, %s4594_s20  ;;  %s4553_s20 = scalar_lea.vmem %s3869_s19, 32 }
0x1444   :  { %p4554_p6 = scmp.ne.s32.totalorder %s3869_s19, %s4553_s20  ;;  %p4559_p8 = scmp.lt.s32.totalorder %s4553_s20, %s4553_s20 }
0x1446   :  { %p4560_p9 = por %p4559_p8, %p4558_p7 }
0x1447   :  { %2809 = vrot.lane.b32.xlu1 %v5010_v51, %s4595_s21 }
0x1448   :  { %p4561_p10 = pnand %p4560_p9, %p4554_p6 }
0x14af   :  { %v2559_v37 = vpop.xlane.xlu0 %2558 }
0x14b0   :  { %v2563_v38 = vsub.f32 %v2475_v25, %v2559_v37 }
0x14b2   :  { %v2565_v39 = vmul.f32 1.442695, %v2563_v38 }
0x14b3   :  { %v2656_v24 = vpop.permute.xlu0 %2655  ;;  %v2562_v43 = vpop.xlane.xlu1 %2561 }
0x14b4   :  { %4437 = vpow2.f32 %v2565_v39  ;;  %v2564_v19 = vsub.f32 %v2553_v31, %v2562_v43  ;;  %4281 = vmatpush3.msra.mxu1 %v2656_v24 }
0x14b5   :  { %4290 = vmatprep.subr.mxu1 %v4587_v15 }
0x14b6   :  { %v2567_v45 = vmul.f32 1.442695, %v2564_v19 }
0x14b7   :  { %v2580_v47 = vpop.permute.xlu1 %2579 }
0x14b8   :  { %4439 = vpow2.f32 %v2567_v45  ;;  %4276 = vmatpush3.msra.mxu0 %v2580_v47 }
0x14b9   :  { %4285 = vmatprep.subr.mxu0 %v4587_v15 }
0x14bb   :  { %v2734_v58 = vpop.permute.xlu1 %2733 }
0x14bf   :  { %v2812_v62 = vpop.permute.xlu1 %2811 }
0x14c1   :  { %v4438_v50 = vpop.eup %4437 }
0x14c2   :  { %v2569_v52 = vsel %vm272_vm2, %v4438_v50, 0.0 }
0x14c3   :  { %2570 = vadd.xlane.f32.xlu0 %v2569_v52  ;;  %v2810_v26 = vpop.permute.xlu1 %2809 }
0x14c5   :  { %v4440_v53 = vpop.eup %4439 }
0x14c6   :  { %v2572_v54 = vsel %vm272_vm2, %v4440_v53, 0.0 }
0x14c7   :  { %2573 = vadd.xlane.f32.xlu0 %v2572_v54 }
0x14dd   :  { %2731 = vrot.lane.b32.xlu0 %v5001_v48, %s4595_s21 }
0x154c   :  { %v2571_v55 = vpop.xlane.xlu0 %2570 }
0x154d   :  { %4441 = vrcp.f32 %v2571_v55 }
0x1550   :  { %v2574_v28 = vpop.xlane.xlu0 %2573 }
0x1551   :  { %4443 = vrcp.f32 %v2574_v28 }
0x1554   :  { %v2732_v0 = vpop.permute.xlu0 %2731 }
0x155a   :  { %v4442_v60 = vpop.eup %4441 }
0x155b   :  { %v2577_v59 = vmul.f32 %v4442_v60, %v4438_v50 }
0x155d   :  { %4278 = vmatmul.mubr.msk.f32.vlgmr.msra.gmra.mxu0 %vm272_vm2, %v2577_v59 }
0x155e   :  { %v4444_v61 = vpop.eup %4443  ;;  %4286 = vmatpush3.xpose.msk.msra.mxu0 %vm272_vm2, %v2734_v58  ;;  %4287 = vmatprep.mubr.msk.f32.mxu0 %vm4588_vm1, %v4587_v15 }
0x155f   :  { %v2578_v63 = vmul.f32 %v4444_v61, %v4440_v53  ;;  %4295 = vmatprep.subr.mxu0 %v4587_v15 }
0x1561   :  { %4283 = vmatmul.mubr.msk.f32.vlgmr.msra.gmra.mxu1 %vm272_vm2, %v2578_v63  ;;  %4288 = vmatmul.mubr.msk.f32.vlgmr.msra.gmra.mxu0 %vm272_vm2, %v2732_v0 }
0x1562   :  { %4291 = vmatpush3.xpose.msk.msra.mxu1 %vm272_vm2, %v2812_v62  ;;  %4292 = vmatprep.mubr.msk.f32.mxu1 %vm4588_vm1, %v4587_v15 }
0x1563   :  { %4300 = vmatprep.subr.mxu1 %v4587_v15  ;;  %4297 = vmatprep.mubr.msk.f32.mxu0 %vm4588_vm1, %v4587_v15 }
0x1565   :  { %4293 = vmatmul.mubr.msk.f32.vlgmr.msra.gmra.mxu1 %vm272_vm2, %v2810_v26 }
0x1566   :  { %4302 = vmatprep.mubr.msk.f32.mxu1 %vm4588_vm1, %v4587_v15 }
0x161d   :  { %v5089_v1 = vpop.f32.mrf.mxu0 }
0x161f   :  { %v4279_v2 = vpop.f32.mrf.mxu0 }
0x1621   :  { %v5091_v3 = vpop.f32.mrf.mxu1  ;;  %v2805_v4 = vpop.f32.mrf.mxu0 }
0x1622   :  { %v2887_v5 = vsel %vm272_vm2, %v2805_v4, -inf }
0x1623   :  { %2888 = vmax.xlane.f32.xlu0 %v2887_v5  ;;  %v4284_v6 = vpop.f32.mrf.mxu1  ;;  %v4289_v7 = vpop.f32.mrf.mxu0 }
0x1625   :  { %v2883_v8 = vpop.f32.mrf.mxu1 }
0x1626   :  { %v2890_v9 = vsel %vm272_vm2, %v2883_v8, -inf }
0x1627   :  { %2891 = vmax.xlane.f32.xlu1 %v2890_v9  ;;  %v4294_v10 = vpop.f32.mrf.mxu1 }
0x1638   :  { %2909 = vrot.lane.b32.xlu1 %v4993_v46, %s4596_s22 }
0x1639   :  { %2985 = vrot.lane.b32.xlu0 %v4991_v44, %s4596_s22 }
0x163c   :  { %3063 = vrot.lane.b32.xlu1 %v4993_v46, %s4597_s23 }
0x1640   :  { %3141 = vrot.lane.b32.xlu1 %v4991_v44, %s4597_s23 }
0x1644   :  { %3139 = vrot.lane.b32.xlu1 %v5010_v51, %s4598_s24 }
0x16ac   :  { %v2889_v11 = vpop.xlane.xlu0 %2888 }
0x16ad   :  { %v2893_v14 = vsub.f32 %v2805_v4, %v2889_v11 }
0x16af   :  { %v2895_v13 = vmul.f32 1.442695, %v2893_v14  ;;  %v3945_v14 = vld [vmem:[%s5257_s4 + $0x30] sm:$0xff] }
0x16b0   :  { %v2986_v12 = vpop.permute.xlu0 %2985  ;;  %v2892_v16 = vpop.xlane.xlu1 %2891 }
0x16b1   :  { %4445 = vpow2.f32 %v2895_v13  ;;  %v2894_v21 = vsub.f32 %v2883_v8, %v2892_v16  ;;  %4301 = vmatpush3.msra.mxu1 %v2986_v12  ;;  %v3944_v13 = vld [vmem:[%s5257_s4 + $0x28] sm:$0xff]  ;;  %v3943_v12 = vld [vmem:[%s5257_s4 + $0x20] sm:$0xff] }
0x16b2   :  { %4310 = vmatprep.subr.mxu1 %v4587_v15 }
0x16b3   :  { %v2897_v25 = vmul.f32 1.442695, %v2894_v21 }
0x16b4   :  { %v2910_v27 = vpop.permute.xlu1 %2909 }
0x16b5   :  { %4447 = vpow2.f32 %v2897_v25  ;;  %4296 = vmatpush3.msra.mxu0 %v2910_v27 }
0x16b6   :  { %4305 = vmatprep.subr.mxu0 %v4587_v15 }
0x16b8   :  { %v3064_v37 = vpop.permute.xlu1 %3063 }
0x16bc   :  { %v3142_v43 = vpop.permute.xlu1 %3141 }
0x16be   :  { %v4446_v29 = vpop.eup %4445 }
0x16bf   :  { %v2899_v30 = vsel %vm272_vm2, %v4446_v29, 0.0 }
0x16c0   :  { %2900 = vadd.xlane.f32.xlu0 %v2899_v30  ;;  %v3140_v45 = vpop.permute.xlu1 %3139 }
0x16c2   :  { %v4448_v51 = vpop.eup %4447 }
0x16c3   :  { %v2902_v31 = vsel %vm272_vm2, %v4448_v51, 0.0 }
0x16c4   :  { %2903 = vadd.xlane.f32.xlu0 %v2902_v31 }
0x16da   :  { %3061 = vrot.lane.b32.xlu0 %v5001_v48, %s4598_s24 }
0x1749   :  { %v2901_v33 = vpop.xlane.xlu0 %2900 }
0x174a   :  { %4449 = vrcp.f32 %v2901_v33 }
0x174d   :  { %v2904_v36 = vpop.xlane.xlu0 %2903 }
0x174e   :  { %4451 = vrcp.f32 %v2904_v36 }
0x1751   :  { %v3062_v48 = vpop.permute.xlu0 %3061 }
0x1757   :  { %v4450_v38 = vpop.eup %4449 }
0x1758   :  { %v2907_v39 = vmul.f32 %v4450_v38, %v4446_v29 }
0x175a   :  { %4298 = vmatmul.mubr.msk.f32.vlgmr.msra.gmra.mxu0 %vm272_vm2, %v2907_v39 }
0x175b   :  { %v4452_v24 = vpop.eup %4451  ;;  %4306 = vmatpush3.xpose.msk.msra.mxu0 %vm272_vm2, %v3064_v37  ;;  %4307 = vmatprep.mubr.msk.f32.mxu0 %vm4588_vm1, %v4587_v15 }
0x175c   :  { %v2908_v19 = vmul.f32 %v4452_v24, %v4448_v51  ;;  %4315 = vmatprep.subr.mxu0 %v4587_v15 }
0x175e   :  { %4303 = vmatmul.mubr.msk.f32.vlgmr.msra.gmra.mxu1 %vm272_vm2, %v2908_v19  ;;  %4308 = vmatmul.mubr.msk.f32.vlgmr.msra.gmra.mxu0 %vm272_vm2, %v3062_v48 }
0x175f   :  { %4311 = vmatpush3.xpose.msk.msra.mxu1 %vm272_vm2, %v3142_v43  ;;  %4312 = vmatprep.mubr.msk.f32.mxu1 %vm4588_vm1, %v4587_v15 }
0x1760   :  { %4320 = vmatprep.subr.mxu1 %v4587_v15  ;;  %4317 = vmatprep.mubr.msk.f32.mxu0 %vm4588_vm1, %v4587_v15 }
0x1762   :  { %4313 = vmatmul.mubr.msk.f32.vlgmr.msra.gmra.mxu1 %vm272_vm2, %v3140_v45 }
0x1763   :  { %4322 = vmatprep.mubr.msk.f32.mxu1 %vm4588_vm1, %v4587_v15 }
0x181a   :  { %v2981_v47 = vpop.f32.mrf.mxu0 }
0x181c   :  { %v4299_v50 = vpop.f32.mrf.mxu0 }
0x181e   :  { %v3057_v52 = vpop.f32.mrf.mxu1  ;;  %v3135_v53 = vpop.f32.mrf.mxu0 }
0x181f   :  { %v3217_v54 = vsel %vm272_vm2, %v3135_v53, -inf }
0x1820   :  { %3218 = vmax.xlane.f32.xlu0 %v3217_v54  ;;  %v4304_v55 = vpop.f32.mrf.mxu1  ;;  %v4309_v28 = vpop.f32.mrf.mxu0 }
0x1822   :  { %v3213_v58 = vpop.f32.mrf.mxu1 }
0x1823   :  { %v3220_v60 = vsel %vm272_vm2, %v3213_v58, -inf }
0x1824   :  { %3221 = vmax.xlane.f32.xlu1 %v3220_v60  ;;  %v4314_v59 = vpop.f32.mrf.mxu1 }
0x1835   :  { %3239 = vrot.lane.b32.xlu1 %v4993_v46, %s4599_s1 }
0x1839   :  { %3393 = vrot.lane.b32.xlu1 %v5089_v1, %s4584_s18 }
0x183d   :  { %3395 = vrot.lane.b32.xlu1 %v5091_v3, %s4584_s18 }
0x1841   :  { %3403 = vrot.lane.b32.xlu1 %v3057_v52, %s4600_s25 }
0x18a9   :  { %v3219_v15 = vpop.xlane.xlu0 %3218 }
0x18aa   :  { %v3223_v61 = vsub.f32 %v3135_v53, %v3219_v15 }
0x18ac   :  { %v3225_v62 = vmul.f32 1.442695, %v3223_v61 }
0x18ad   :  { %v3222_v63 = vpop.xlane.xlu1 %3221 }
0x18ae   :  { %4453 = vpow2.f32 %v3225_v62  ;;  %v3224_v0 = vsub.f32 %v3213_v58, %v3222_v63  ;;  %v3951_v63 = vld [vmem:[%s5258_s5 + $0x30] sm:$0xff] }
0x18b0   :  { %v3227_v26 = vmul.f32 1.442695, %v3224_v0  ;;  %v3950_v0 = vld [vmem:[%s5258_s5 + $0x28] sm:$0xff] }
0x18b1   :  { %v3240_v2 = vpop.permute.xlu1 %3239 }
0x18b2   :  { %4455 = vpow2.f32 %v3227_v26  ;;  %4316 = vmatpush3.msra.mxu0 %v3240_v2  ;;  %v3949_v26 = vld [vmem:[%s5258_s5 + $0x20] sm:$0xff]  ;;  %v3962_v2 = vld [vmem:[%s5259_s6 + $0x78] sm:$0xff] }
0x18b5   :  { %v3394_v29 = vpop.permute.xlu1 %3393 }
0x18b6   :  { %v3415_v31 = vsel %vm272_vm2, %v5051_v20, %v3394_v29  ;;  %v3429_v20 = vrot.slane %v4987_v42, %v1628_v57  ;;  %v3956_v29 = vld [vmem:[%s5259_s6 + $0x48] sm:$0xff] }
0x18b9   :  { %v3396_v30 = vpop.permute.xlu1 %3395 }
0x18ba   :  { %v3416_v39 = vsel %vm272_vm2, %v5053_v22, %v3396_v30  ;;  %v3955_v30 = vld [vmem:[%s5259_s6 + $0x40] sm:$0xff] }
0x18bb   :  { %v4454_v4 = vpop.eup %4453 }
0x18bc   :  { %v3229_v46 = vsel %vm272_vm2, %v4454_v4, 0.0 }
0x18bd   :  { %3230 = vadd.xlane.f32.xlu0 %v3229_v46  ;;  %v3404_v33 = vpop.permute.xlu1 %3403  ;;  %v3960_v46 = vld [vmem:[%s5259_s6 + $0x68] sm:$0xff] }
0x18be   :  { %v3418_v24 = vsel %vm1616_vm3, %v3416_v39, %v3404_v33 }
0x18bf   :  { %v4456_v1 = vpop.eup %4455 }
0x18c0   :  { %v3232_v5 = vsel %vm272_vm2, %v4456_v1, 0.0 }
0x18c1   :  { %3233 = vadd.xlane.f32.xlu0 %v3232_v5 }
0x18d7   :  { %3315 = vrot.lane.b32.xlu0 %v4991_v44, %s4599_s1  ;;  %v3946_v44 = vld [vmem:[%s5257_s4 + $0x38] sm:$0xff] }
0x18d8   :  { %4325 = vmatprep.subr.mxu0 %v3946_v44 }
0x18db   :  { %3401 = vrot.lane.b32.xlu0 %v2981_v47, %s4600_s25 }
0x1946   :  { %v3231_v3 = vpop.xlane.xlu0 %3230 }
0x1947   :  { %4457 = vrcp.f32 %v3231_v3 }
0x194a   :  { %v3234_v6 = vpop.xlane.xlu0 %3233 }
0x194b   :  { %4459 = vrcp.f32 %v3234_v6 }
0x194e   :  { %v3316_v7 = vpop.permute.xlu0 %3315 }
0x194f   :  { %4321 = vmatpush3.msra.mxu1 %v3316_v7 }
0x1952   :  { %v3402_v51 = vpop.permute.xlu0 %3401 }
0x1953   :  { %v3417_v36 = vsel %vm1616_vm3, %v3415_v31, %v3402_v51  ;;  %v3559_v51 = vrot.slane %v4987_v42, %v4940_v49 }
0x1954   :  { %v4458_v8 = vpop.eup %4457 }
0x1955   :  { %v3237_v9 = vmul.f32 %v4458_v8, %v4454_v4  ;;  %v3961_v4 = vld [vmem:[%s5259_s6 + $0x70] sm:$0xff] }
0x1957   :  { %4318 = vmatmul.mubr.msk.f32.vlgmr.msra.gmra.mxu0 %vm272_vm2, %v3237_v9 }
0x1958   :  { %v4460_v10 = vpop.eup %4459  ;;  %4326 = vmatpush3.msra.mxu0 %v3946_v44 }
0x1959   :  { %v3238_v11 = vmul.f32 %v4460_v10, %v4456_v1  ;;  %4327 = vmatprep.subr.mxu0 %v3945_v14  ;;  %v3959_v1 = vld [vmem:[%s5259_s6 + $0x60] sm:$0xff]  ;;  %v3542_v10 = vrot.slane %v4987_v42, %v1742_v34  ;;  %v3958_v34 = vld [vmem:[%s5259_s6 + $0x58] sm:$0xff] }
0x195a   :  { %4328 = vmatpush3.msra.mxu0 %v3945_v14  ;;  %v3548_v14 = vrot.slane %v4987_v42, %v1748_v35  ;;  %v3957_v35 = vld [vmem:[%s5259_s6 + $0x50] sm:$0xff] }
0x195b   :  { %4323 = vmatmul.mubr.msk.f32.vlgmr.msra.gmra.mxu1 %vm272_vm2, %v3238_v11  ;;  %4329 = vmatprep.subr.mxu0 %v3944_v13 }
0x195c   :  { %4330 = vmatpush3.msra.mxu0 %v3944_v13 }
0x195d   :  { %4331 = vmatprep.subr.mxu0 %v3943_v12 }
0x195e   :  { %4332 = vmatpush3.msra.mxu0 %v3943_v12 }
0x195f   :  { %4347 = vmatprep.subr.mxu0 %v3962_v2 }
0x1a17   :  { %v3311_v16 = vpop.f32.mrf.mxu0 }
0x1a18   :  { %3409 = vrot.lane.b32.xlu0 %v3311_v16, %s4601_s10 }
0x1a19   :  { %v4319_v21 = vpop.f32.mrf.mxu0 }
0x1a1b   :  { %v3387_v25 = vpop.f32.mrf.mxu1 }
0x1a1c   :  { %3411 = vrot.lane.b32.xlu1 %v3387_v25, %s4601_s10 }
0x1a1d   :  { %v4324_v27 = vpop.f32.mrf.mxu1 }
0x1a8a   :  { %v3410_v37 = vpop.permute.xlu0 %3409 }
0x1a8b   :  { %v3419_v38 = vsel %vm1619_vm4, %v3417_v36, %v3410_v37 }
0x1a8c   :  { %4333 = vmatprep.mubr.msk.f32.mxu0 %vm92_vm0, %v3419_v38 }
0x1a8e   :  { %v3412_v43 = vpop.permute.xlu1 %3411 }
0x1a8f   :  { %v3420_v19 = vsel %vm1619_vm4, %v3418_v24, %v3412_v43  ;;  %v3655_v24 = vrot.slane %v4987_v42, %v1853_v56 }
0x1a90   :  { %4334 = vmatmul.mubr.msk.f32.vlgmr.msra.gmra.mxu0 %vm92_vm0, %v3420_v19 }
0x1a91   :  { %4348 = vmatpush3.msra.mxu0 %v3962_v2 }
0x1a92   :  { %4349 = vmatprep.subr.mxu0 %v3961_v4 }
0x1a93   :  { %4350 = vmatpush3.msra.mxu0 %v3961_v4  ;;  %v3774_v4 = vrot.slane %v4987_v42, %v1973_v32 }
0x1a94   :  { %4351 = vmatprep.subr.mxu0 %v3960_v46 }
0x1a95   :  { %4352 = vmatpush3.msra.mxu0 %v3960_v46 }
0x1a96   :  { %4353 = vmatprep.subr.mxu0 %v3959_v1 }
0x1a97   :  { %4354 = vmatpush3.msra.mxu0 %v3959_v1 }
0x1a98   :  { %4355 = vmatprep.subr.mxu0 %v3958_v34 }
0x1a99   :  { %4356 = vmatpush3.msra.mxu0 %v3958_v34 }
0x1a9a   :  { %4357 = vmatprep.subr.mxu0 %v3957_v35 }
0x1a9b   :  { %4358 = vmatpush3.msra.mxu0 %v3957_v35 }
0x1a9c   :  { %4359 = vmatprep.subr.mxu0 %v3956_v29 }
0x1a9d   :  { %4360 = vmatpush3.msra.mxu0 %v3956_v29  ;;  %v3777_v29 = vld [vmem:[%s5261_s8] sm:$0x3]  ;;  %s4602_s8 = smov 32  }
0x1a9e   :  { %4361 = vmatprep.subr.mxu0 %v3955_v30 }
0x1a9f   :  { %4362 = vmatpush3.msra.mxu0 %v3955_v30  ;;  %v3807_v30 = vrot.slane %v3777_v29, %v4700_v18 }
0x1b50   :  { %v4335_v48 = vpop.f32.mrf.mxu0 }
0x1b51   :  { %v3508_v45 = vadd.f32 %v4335_v48, %v3429_v20 }
0x1b52   :  { %v3502_v47 = vpop.f32.mrf.mxu0 }
0x1b53   :  { %v3512_v50 = vadd.f32 %v3508_v45, %v4979_v41  ;;  %v3503_v52 = vadd.f32 %v3502_v47, %v3429_v20 }
0x1b55   :  { %v3516_v53 = vsel %vm92_vm0, %v3512_v50, 0.0  ;;  %v3511_v22 = vadd.f32 %v3503_v52, %v4977_v40  ;;  %v3952_v40 = vld [vmem:[%s5258_s5 + $0x38] sm:$0xff] }
0x1b56   :  { %3517 = vadd.xlane.f32.xlu1 %v3516_v53  ;;  %4336 = vmatprep.subr.mxu1 %v3952_v40 }
0x1b57   :  { %v3513_v54 = vsel %vm92_vm0, %v3511_v22, 0.0  ;;  %4337 = vmatpush3.msra.mxu1 %v3952_v40 }
0x1b58   :  { %3514 = vadd.xlane.f32.xlu0 %v3513_v54  ;;  %4338 = vmatprep.subr.mxu1 %v3951_v63 }
0x1b59   :  { %4339 = vmatpush3.msra.mxu1 %v3951_v63 }
0x1b5a   :  { %4340 = vmatprep.subr.mxu1 %v3950_v0 }
0x1b5b   :  { %4341 = vmatpush3.msra.mxu1 %v3950_v0  ;;  %v3768_v0 = vrot.slane %v4987_v42, %v1967_v23 }
0x1b5c   :  { %4342 = vmatprep.subr.mxu1 %v3949_v26 }
0x1b5d   :  { %4343 = vmatpush3.msra.mxu1 %v3949_v26 }
0x1bdf   :  { %v3518_v55 = vpop.xlane.xlu1 %3517 }
0x1be0   :  { %v3520_v28 = vmul.f32 0.03125, %v3518_v55 }
0x1be1   :  { %v3515_v58 = vpop.xlane.xlu0 %3514 }
0x1be2   :  { %v3519_v60 = vmul.f32 0.03125, %v3515_v58  ;;  %v3522_v59 = vsub.f32 %v3512_v50, %v3520_v28 }
0x1be4   :  { %v3521_v57 = vsub.f32 %v3511_v22, %v3519_v60  ;;  %v3524_v62 = vmul.f32 %v3522_v59, %v3522_v59 }
0x1be6   :  { %v3523_v15 = vmul.f32 %v3521_v57, %v3521_v57  ;;  %v3528_v41 = vsel %vm92_vm0, %v3524_v62, 0.0 }
0x1be8   :  { %v3525_v61 = vsel %vm92_vm0, %v3523_v15, 0.0 }
0x1be9   :  { %3526 = vadd.xlane.f32.xlu0 %v3525_v61 }
0x1bed   :  { %3529 = vadd.xlane.f32.xlu0 %v3528_v41 }
0x1c72   :  { %v3527_v5 = vpop.xlane.xlu0 %3526 }
0x1c73   :  { %v3531_v3 = vmul.f32 0.03125, %v3527_v5 }
0x1c75   :  { %v3533_v6 = vadd.f32 1e-05, %v3531_v3 }
0x1c76   :  { %v3530_v7 = vpop.xlane.xlu0 %3529 }
0x1c77   :  { %4461 = vrsqrt.f32 %v3533_v6  ;;  %v3532_v8 = vmul.f32 0.03125, %v3530_v7 }
0x1c79   :  { %v3534_v9 = vadd.f32 1e-05, %v3532_v8 }
0x1c7b   :  { %4463 = vrsqrt.f32 %v3534_v9 }
0x1c84   :  { %v4462_v11 = vpop.eup %4461 }
0x1c85   :  { %v3537_v44 = vmul.f32 %v4462_v11, %v3521_v57 }
0x1c87   :  { %v3543_v13 = vmul.f32 %v3542_v10, %v3537_v44 }
0x1c88   :  { %v4464_v12 = vpop.eup %4463 }
0x1c89   :  { %v3538_v16 = vmul.f32 %v4464_v12, %v3522_v59  ;;  %v3549_v21 = vadd.f32 %v3548_v14, %v3543_v13 }
0x1c8b   :  { %v3544_v25 = vmul.f32 %v3542_v10, %v3538_v16  ;;  %4344 = vmatprep.mubr.msk.f32.mxu1 %vm92_vm0, %v3549_v21 }
0x1c8d   :  { %v3550_v27 = vadd.f32 %v3548_v14, %v3544_v25 }
0x1c8f   :  { %4345 = vmatmul.mubr.msk.f32.vlgmr.msra.gmra.mxu1 %vm92_vm0, %v3550_v27 }
0x1d4f   :  { %v4346_v31 = vpop.f32.mrf.mxu1 }
0x1d50   :  { %v3638_v33 = vadd.f32 %v4346_v31, %v3559_v51  ;;  %v3813_v31 = vrot.slane %v3777_v29, %v4940_v49 }
0x1d51   :  { %v3632_v36 = vpop.f32.mrf.mxu1 }
0x1d52   :  { %v3633_v37 = vadd.f32 %v3632_v36, %v3559_v51  ;;  %v3642_v39 = vmax.f32 %v3638_v33, 0.0 }
0x1d54   :  { %v3641_v38 = vmax.f32 %v3633_v37, 0.0 }
0x1d56   :  { %4363 = vmatprep.mubr.msk.f32.mxu0 %vm1855_vm5, %v3641_v38 }
0x1d57   :  { %4364 = vmatmul.mubr.msk.f32.vlgmr.msra.gmra.mxu0 %vm1855_vm5, %v3642_v39 }
0x1e17   :  { %v4365_v43 = vpop.f32.mrf.mxu0 }
0x1e18   :  { %v3734_v19 = vadd.f32 %v4365_v43, %v3655_v24 }
0x1e19   :  { %v3728_v20 = vpop.f32.mrf.mxu0 }
0x1e1a   :  { %v3729_v48 = vadd.f32 %v3728_v20, %v3655_v24  ;;  %v3738_v45 = vadd.f32 %v3734_v19, %v3550_v27 }
0x1e1c   :  { %v3737_v47 = vadd.f32 %v3729_v48, %v3549_v21  ;;  %v3742_v50 = vsel %vm92_vm0, %v3738_v45, 0.0 }
0x1e1d   :  { %3743 = vadd.xlane.f32.xlu0 %v3742_v50 }
0x1e1e   :  { %v3739_v52 = vsel %vm92_vm0, %v3737_v47, 0.0 }
0x1e1f   :  { %3740 = vadd.xlane.f32.xlu1 %v3739_v52 }
0x1ea6   :  { %v3744_v53 = vpop.xlane.xlu0 %3743 }
0x1ea7   :  { %v3746_v22 = vmul.f32 0.03125, %v3744_v53 }
0x1ea8   :  { %v3741_v54 = vpop.xlane.xlu1 %3740 }
0x1ea9   :  { %v3748_v55 = vsub.f32 %v3738_v45, %v3746_v22  ;;  %v3745_v28 = vmul.f32 0.03125, %v3741_v54 }
0x1eab   :  { %v3747_v58 = vsub.f32 %v3737_v47, %v3745_v28  ;;  %v3750_v60 = vmul.f32 %v3748_v55, %v3748_v55 }
0x1ead   :  { %v3754_v56 = vsel %vm92_vm0, %v3750_v60, 0.0  ;;  %v3749_v59 = vmul.f32 %v3747_v58, %v3747_v58 }
0x1eae   :  { %3755 = vadd.xlane.f32.xlu0 %v3754_v56 }
0x1eaf   :  { %v3751_v57 = vsel %vm92_vm0, %v3749_v59, 0.0 }
0x1eb0   :  { %3752 = vadd.xlane.f32.xlu1 %v3751_v57 }
0x1f37   :  { %v3756_v15 = vpop.xlane.xlu0 %3755 }
0x1f38   :  { %v3758_v61 = vmul.f32 0.03125, %v3756_v15 }
0x1f39   :  { %v3753_v62 = vpop.xlane.xlu1 %3752 }
0x1f3a   :  { %v3760_v41 = vadd.f32 1e-05, %v3758_v61  ;;  %v3757_v40 = vmul.f32 0.03125, %v3753_v62 }
0x1f3c   :  { %4465 = vrsqrt.f32 %v3760_v41  ;;  %v3759_v63 = vadd.f32 1e-05, %v3757_v40 }
0x1f3e   :  { %4467 = vrsqrt.f32 %v3759_v63 }
0x1f49   :  { %v4466_v26 = vpop.eup %4465 }
0x1f4a   :  { %v3764_v2 = vmul.f32 %v4466_v26, %v3748_v55 }
0x1f4b   :  { %v4468_v46 = vpop.eup %4467 }
0x1f4c   :  { %v3770_v1 = vmul.f32 %v3768_v0, %v3764_v2  ;;  %v3763_v5 = vmul.f32 %v4468_v46, %v3747_v58 }
0x1f4e   :  { %v3776_v3 = vadd.f32 %v3774_v4, %v3770_v1  ;;  %v3769_v6 = vmul.f32 %v3768_v0, %v3763_v5 }
0x1f50   :  { %v3781_v7 = vsel %vm92_vm0, %v3776_v3, 0.0  ;;  %v3775_v8 = vadd.f32 %v3774_v4, %v3769_v6 }
0x1f51   :  { %3782 = vadd.xlane.f32.xlu0 %v3781_v7 }
0x1f52   :  { %v3778_v9 = vsel %vm92_vm0, %v3775_v8, 0.0 }
0x1f53   :  { %3779 = vadd.xlane.f32.xlu1 %v3778_v9 }
0x1fda   :  { %v3783_v10 = vpop.xlane.xlu0 %3782 }
0x1fdb   :  { %v3785_v23 = vmul.f32 0.03125, %v3783_v10 }
0x1fdc   :  { %v3780_v11 = vpop.xlane.xlu1 %3779 }
0x1fdd   :  { %v3787_v44 = vsub.f32 %v3776_v3, %v3785_v23  ;;  %v3784_v14 = vmul.f32 0.03125, %v3780_v11 }
0x1fdf   :  { %v3786_v17 = vsub.f32 %v3775_v8, %v3784_v14  ;;  %v3789_v13 = vmul.f32 %v3787_v44, %v3787_v44 }
0x1fe1   :  { %v3793_v32 = vsel %vm92_vm0, %v3789_v13, 0.0  ;;  %v3788_v42 = vmul.f32 %v3786_v17, %v3786_v17 }
0x1fe2   :  { %3794 = vadd.xlane.f32.xlu0 %v3793_v32 }
0x1fe3   :  { %v3790_v12 = vsel %vm92_vm0, %v3788_v42, 0.0 }
0x1fe4   :  { %3791 = vadd.xlane.f32.xlu1 %v3790_v12 }
0x206b   :  { %v3795_v16 = vpop.xlane.xlu0 %3794 }
0x206c   :  { %v3797_v21 = vmul.f32 0.03125, %v3795_v16 }
0x206d   :  { %v3792_v25 = vpop.xlane.xlu1 %3791 }
0x206e   :  { %v3799_v27 = vadd.f32 1e-05, %v3797_v21  ;;  %v3796_v34 = vmul.f32 0.03125, %v3792_v25 }
0x2070   :  { %4469 = vrsqrt.f32 %v3799_v27  ;;  %v3798_v35 = vadd.f32 1e-05, %v3796_v34 }
0x2072   :  { %4471 = vrsqrt.f32 %v3798_v35 }
0x207d   :  { %v4470_v51 = vpop.eup %4469 }
0x207e   :  { %v3803_v33 = vmul.f32 %v4470_v51, %v3787_v44 }
0x207f   :  { %v4472_v36 = vpop.eup %4471 }
0x2080   :  { %v3809_v37 = vmul.f32 %v3807_v30, %v3803_v33  ;;  %v3802_v38 = vmul.f32 %v4472_v36, %v3786_v17 }
0x2082   :  { %v3808_v39 = vmul.f32 %v3807_v30, %v3802_v38  ;;  %v3815_v24 = vadd.f32 %v3813_v31, %v3809_v37 }
0x2084   :  { %v3814_v43 = vadd.f32 %v3813_v31, %v3808_v39  ;;  %v3823_v19 = vsel %vm92_vm0, %v3815_v24, 0.0  ;;  %v3847_v20 = vsel %vm92_vm0, %v3815_v24, -inf }
0x2085   :  { %v3824_v48 = vrot.slane %v3823_v19, 4  ;;  %v3848_v45 = vrot.slane %v3847_v20, 4 }
0x2086   :  { %v3840_v47 = vsel %vm92_vm0, %v3814_v43, -inf  ;;  %v3816_v18 = vsel %vm92_vm0, %v3814_v43, 0.0 }
0x2087   :  { %v3841_v50 = vrot.slane %v3840_v47, 4  ;;  %v3849_v52 = vmax.f32 %v3847_v20, %v3848_v45  ;;  %v3817_v49 = vrot.slane %v3816_v18, 4  ;;  %v3825_v53 = vadd.f32 %v3824_v48, %v3823_v19 }
0x2089   :  { %v3842_v22 = vmax.f32 %v3840_v47, %v3841_v50  ;;  %v3850_v54 = vrot.slane %v3849_v52, 2  ;;  %v3818_v55 = vadd.f32 %v3817_v49, %v3816_v18  ;;  %v3826_v28 = vrot.slane %v3825_v53, 2 }
0x208b   :  { %v3843_v58 = vrot.slane %v3842_v22, 2  ;;  %v3851_v60 = vmax.f32 %v3849_v52, %v3850_v54  ;;  %v3819_v56 = vrot.slane %v3818_v55, 2  ;;  %v3827_v59 = vadd.f32 %v3826_v28, %v3825_v53 }
0x208d   :  { %v3844_v57 = vmax.f32 %v3842_v22, %v3843_v58  ;;  %v3852_v15 = vrot.slane %v3851_v60, 1  ;;  %v3820_v61 = vadd.f32 %v3819_v56, %v3818_v55  ;;  %v3828_v62 = vrot.slane %v3827_v59, 1 }
0x208f   :  { %v3845_v41 = vrot.slane %v3844_v57, 1  ;;  %v3821_v40 = vrot.slane %v3820_v61, 1  ;;  %v3829_v63 = vadd.f32 %v3828_v62, %v3827_v59  ;;  %v3853_v26 = vmax.f32 %v3851_v60, %v3852_v15 }
0x2091   :  { %v3846_v0 = vmax.f32 %v3844_v57, %v3845_v41  ;;  %v3822_v2 = vadd.f32 %v3821_v40, %v3820_v61  ;;  %v3832_v1 = vmul.f32 0.125, %v3829_v63 }
0x2093   :  { %v3856_v4 = vsel %vm3835_vm6, %v3853_v26, %v3846_v0  ;;  %v3831_v46 = vmul.f32 0.125, %v3822_v2 }
0x2094   :  { %3857 = vrot.lane.b32.xlu1 %v3856_v4, %s4602_s8 }
0x2095   :  { %v3836_v5 = vsel %vm3835_vm6, %v3832_v1, %v3831_v46 }
0x2096   :  { %3839 = vst.msk [vmem:[#allocation10] sm:$0x3] %vm3838_vm7, %v3836_v5 }
0x2106   :  { %v3858_v3 = vpop.permute.xlu1 %3857 }
0x2107   :  { %3861 = vst.msk [vmem:[#allocation10] sm:$0x3] %vm3860_vm8, %v3858_v3 }
0x2108   :  { %4564 = shalt.err (!%p4561_p10)
}
0x2109   :  { %3871 = dma.vmem_to_hbm [thread:$0]  %s3869_s19, 32, %s5262_s9, [#allocation4]  }
0x210a   :  { %4579 = dma.done.wait [#allocation4], 32  }
0x210b   :  { %4580 = vsyncadd [#allocation4], 4294967264 }
0x210c   :  { %3875 = vsyncpa [#allocation3], 1 }
0x210d   :  { %3876 = vsyncpa [#allocation6], 1 }
0x210e   :  { %3877 = vsyncpa [#allocation9], 1 }
0x210f   :  { %3878 = vsyncpa [#allocation4], 1 }

</bundles_post_ra>
